<compile_context>
chip_gen: v5e
topology: v5e:2x2
jax: 0.10.0
libtpu: 0.0.40
codegen_flags: <defaults>
</compile_context>

<pallas_src>
import jax
import jax.numpy as jnp
from jax.experimental import pallas as pl
from jax.experimental.pallas import tpu as pltpu


# ----------------------------------------------------------------------------
# fused kernel: n_layer x (pre-LN -> gated dot self-attn -> residual -> FFN)
#               + final shared LayerNorm, carried state resident in out_ref
# ----------------------------------------------------------------------------
def _mlsa_kernel(mb_ref, mask_ref, ln_g_ref, ln_b_ref,
                 w_ctx_ref, w_xn_ref, b_gate_ref,
                 ff_g_ref, ff_b_ref, w1_ref, b1_ref, w2_ref, b2_ref,
                 out_ref):
    layer = pl.program_id(1)
    n_layer = pl.num_programs(1)

    # Layer 0 of each batch tile: seed the carried state. out_ref stays resident
    # across the whole "arbitrary" layer axis, so no extra VMEM scratch is needed.
    @pl.when(layer == 0)
    def _():
        out_ref[...] = mb_ref[...]

    x = out_ref[...]                                  # (tb, L, D) carried state, f32
    tb, L, D = x.shape

    def layer_norm(v, g, b):
        mu = jnp.mean(v, axis=-1, keepdims=True)
        var = jnp.mean(jnp.square(v - mu), axis=-1, keepdims=True)
        return (v - mu) * jax.lax.rsqrt(var + 1e-6) * g + b

    ln_g = ln_g_ref[...]                              # (1, D), broadcasts on last dim
    ln_b = ln_b_ref[...]

    # ---- pre-attention LayerNorm (shared weights) ---------------------------
    xn = layer_norm(x, ln_g, ln_b)                    # (tb, L, D) f32
    xn_bf = xn.astype(jnp.bfloat16)                   # bf16 operand for all MXU matmuls

    # ---- gated dot-product self-attention (all matmuls on the MXU) ----------
    scores = jax.lax.dot_general(                     # (tb, L, L) = xn @ xn^T
        xn_bf, xn_bf, (((2,), (2,)), ((0,), (0,))),
        preferred_element_type=jnp.float32)
    scores = scores + mask_ref[...]                   # additive -1e9 mask, (tb, 1, L)
    scores = scores - jnp.max(scores, axis=-1, keepdims=True)
    e = jnp.exp(scores)
    p = e * pl.reciprocal(jnp.sum(e, axis=-1, keepdims=True), approx=True)
    ctx = jax.lax.dot_general(                        # (tb, L, D) = p @ xn
        p.astype(jnp.bfloat16), xn_bf, (((2,), (1,)), ((0,), (0,))),
        preferred_element_type=jnp.float32)

    # Fused linear_out + gate projection with the concat eliminated:
    #   proj = ctx @ W_ctx + xn @ W_xn   (each (tb*L,128)x(128,256), lane-dense N=256)
    #   proj[:, :D] -> tanh path, proj[:, D:] -> sigmoid gate pre-activation.
    ctx2 = ctx.astype(jnp.bfloat16).reshape(tb * L, D)
    xn2 = xn_bf.reshape(tb * L, D)
    proj = (jnp.dot(ctx2, w_ctx_ref[0], preferred_element_type=jnp.float32)
            + jnp.dot(xn2, w_xn_ref[0], preferred_element_type=jnp.float32))
    attn_h = jnp.tanh(proj[:, :D])
    # TODO(synk): exact gate form of onmt.modules.GlobalSelfAttention is not in the
    # spec; concretized as sigmoid(W_g [ctx; x_norm] + b_g) * tanh(W_out [ctx; x_norm]).
    gate = jax.nn.sigmoid(proj[:, D:] + b_gate_ref[0])
    y = (gate * attn_h).reshape(tb, L, D) + x         # residual (dropout = identity)

    # ---- shared PositionwiseFeedForward: pre-LN, ReLU MLP, residual ----------
    yn = layer_norm(y, ff_g_ref[...], ff_b_ref[...]).reshape(tb * L, D)
    inter = jnp.maximum(
        jnp.dot(yn.astype(jnp.bfloat16), w1_ref[...],
                preferred_element_type=jnp.float32) + b1_ref[...], 0.0)   # (tb*L, F)
    ffn = jnp.dot(inter.astype(jnp.bfloat16), w2_ref[...],
                  preferred_element_type=jnp.float32) + b2_ref[...]
    y = y + ffn.reshape(tb, L, D)

    # Carry for the next layer; final shared LayerNorm written once on the last layer.
    @pl.when(layer < n_layer - 1)
    def _():
        out_ref[...] = y

    @pl.when(layer == n_layer - 1)
    def _():
        out_ref[...] = layer_norm(y, ln_g, ln_b)


# ----------------------------------------------------------------------------
# wrapper: mask + weight packing (fuse/ split / bf16-cast), one pallas_call
# ----------------------------------------------------------------------------
def multi_layer_self_attention(params, inputs, memory_bank, memory_lengths=None,
                               coverage=None, *, batch_tile=1):
    # `inputs` and `coverage` are unused by the reference forward (kept for parity).
    del inputs, coverage
    B, L, D = memory_bank.shape
    n_layer = params["w_out"].shape[0]
    F = params["w1"].shape[1]
    tb = batch_tile if (batch_tile and B % batch_tile == 0) else B

    # additive length mask, precomputed in its broadcast layout (B, 1, L)
    if memory_lengths is None:
        mask = jnp.zeros((B, 1, L), jnp.float32)
    else:
        pos = jnp.arange(L, dtype=jnp.int32)[None, :]
        mask = jnp.where(pos < memory_lengths[:, None], 0.0, -1e9)
        mask = mask.astype(jnp.float32).reshape(B, 1, L)

    # Fuse linear_out + gate into one per-layer (2D -> 2D) projection and pre-split it
    # into ctx / x_norm halves so the kernel never concatenates along the lane dim.
    # All matmul weights go to bf16 (accumulation stays f32 on the MXU).
    w_fused = jnp.concatenate([params["w_out"], params["w_gate"]], axis=-1)  # (nl,2D,2D)
    w_ctx = w_fused[:, :D, :].astype(jnp.bfloat16)                           # (nl, D, 2D)
    w_xn = w_fused[:, D:, :].astype(jnp.bfloat16)                            # (nl, D, 2D)
    w1 = params["w1"].astype(jnp.bfloat16)
    w2 = params["w2"].astype(jnp.bfloat16)

    row = lambda v: v.reshape(1, -1).astype(jnp.float32)
    const2 = lambda i, l: (0, 0)
    per_layer = lambda i, l: (l, 0, 0)
    per_tile = lambda i, l: (i, 0, 0)

    # Explicit scoped-VMEM budget: double-buffered input blocks + resident output tile
    # + headroom for in-flight activations (scores, proj, FFN intermediate).
    bf2, f4 = 2, 4
    in_block_bytes = (tb * L * D * f4 + tb * L * f4 + 4 * D * f4
                      + 2 * D * 2 * D * bf2 + D * f4
                      + 2 * D * F * bf2 + (F + D) * f4)
    act_bytes = tb * L * (L + 6 * D + 2 * F) * f4
    vmem_limit = int(min(max(2 * in_block_bytes + tb * L * D * f4 + act_bytes,
                             16 * 1024 * 1024), 64 * 1024 * 1024))

    out_bld = pl.pallas_call(
        _mlsa_kernel,
        out_shape=jax.ShapeDtypeStruct((B, L, D), jnp.float32),
        grid_spec=pltpu.PrefetchScalarGridSpec(
            num_scalar_prefetch=0,
            grid=(B // tb, n_layer),                     # (batch tiles, layer stack)
            in_specs=[
                pl.BlockSpec((tb, L, D), per_tile),      # memory_bank tile (f32)
                pl.BlockSpec((tb, 1, L), per_tile),      # additive length mask
                pl.BlockSpec((1, D), const2),            # shared LN gain
                pl.BlockSpec((1, D), const2),            # shared LN bias
                pl.BlockSpec((1, D, 2 * D), per_layer),  # fused proj, ctx half (bf16)
                pl.BlockSpec((1, D, 2 * D), per_layer),  # fused proj, x_norm half (bf16)
                pl.BlockSpec((1, 1, D), per_layer),      # gate bias (per layer)
                pl.BlockSpec((1, D), const2),            # FFN LN gain
                pl.BlockSpec((1, D), const2),            # FFN LN bias
                pl.BlockSpec((D, F), const2),            # FFN w1 (bf16)
                pl.BlockSpec((1, F), const2),            # FFN b1
                pl.BlockSpec((F, D), const2),            # FFN w2 (bf16)
                pl.BlockSpec((1, D), const2),            # FFN b2
            ],
            out_specs=pl.BlockSpec((tb, L, D), per_tile),
        ),
        compiler_params=pltpu.CompilerParams(
            dimension_semantics=("parallel", "arbitrary"),   # batch tiles shard on v7x
            vmem_limit_bytes=vmem_limit),
    )(memory_bank.astype(jnp.float32), mask,
      row(params["ln_g"]), row(params["ln_b"]),
      w_ctx, w_xn, params["b_gate"].astype(jnp.float32),
      row(params["ff_ln_g"]), row(params["ff_ln_b"]),
      w1, row(params["b1"]), w2, row(params["b2"]))

    # PyTorch contract: (layer_norm(memory_bank).transpose(0, 1), None) -> (L, B, D).
    # Single small transpose on the final tensor only (kept in the wrapper because the
    # in-kernel layer-state carry uses out_ref in batch-major layout).
    return jnp.transpose(out_bld, (1, 0, 2)), None


# ----------------------------------------------------------------------------
if __name__ == "__main__":
    B, L, D = 2, 8, 128          # batch, sequence, emb_size (lane-dense feature dim)
    FFN_HIDDEN = 2048            # fixed in the module: PositionwiseFeedForward(emb, 2048)
    N_LAYER = 2

    key = jax.random.PRNGKey(0)
    ks = jax.random.split(key, 10)

    def init(k, shape, scale=0.05):
        return scale * jax.random.normal(k, shape, jnp.float32)

    params = {
        # shared LayerNorm (pre-attention norm + final output norm)
        "ln_g": jnp.ones((D,), jnp.float32),
        "ln_b": jnp.zeros((D,), jnp.float32),
        # per-layer GlobalSelfAttention (dot type, gated): [ctx ; x_norm] -> D
        "w_out": init(ks[0], (N_LAYER, 2 * D, D)),
        "w_gate": init(ks[1], (N_LAYER, 2 * D, D)),
        "b_gate": init(ks[2], (N_LAYER, 1, D)),
        # shared PositionwiseFeedForward
        "ff_ln_g": jnp.ones((D,), jnp.float32),
        "ff_ln_b": jnp.zeros((D,), jnp.float32),
        "w1": init(ks[3], (D, FFN_HIDDEN)),
        "b1": init(ks[4], (FFN_HIDDEN,)),
        "w2": init(ks[5], (FFN_HIDDEN, D)),
        "b2": init(ks[6], (D,)),
    }

    memory_bank = init(ks[7], (B, L, D), scale=1.0)    # batch-major, as the module expects
    memory_lengths = jnp.array([L, 5], jnp.int32)
    dummy_input = init(ks[8], (L, B, D), scale=1.0)    # unused by the reference forward

    out, attn = multi_layer_self_attention(params, dummy_input, memory_bank,
                                           memory_lengths)
    out = jax.block_until_ready(out)

    assert out.shape == (L, B, D)
    assert attn is None
    assert bool(jnp.all(jnp.isfinite(out)))
    print("KERNEL_OK")
</pallas_src>

<mosaic_0001>
module attributes {stable_mosaic.version = 11 : i64} {
  func.func @_mlsa_kernel(%arg0: i32, %arg1: i32, %arg2: memref<1x8x128xf32, #tpu.memory_space<vmem>>, %arg3: memref<1x1x8xf32, #tpu.memory_space<vmem>>, %arg4: memref<1x128xf32, #tpu.memory_space<vmem>>, %arg5: memref<1x128xf32, #tpu.memory_space<vmem>>, %arg6: memref<1x128x256xbf16, #tpu.memory_space<vmem>>, %arg7: memref<1x128x256xbf16, #tpu.memory_space<vmem>>, %arg8: memref<1x1x128xf32, #tpu.memory_space<vmem>>, %arg9: memref<1x128xf32, #tpu.memory_space<vmem>>, %arg10: memref<1x128xf32, #tpu.memory_space<vmem>>, %arg11: memref<128x2048xbf16, #tpu.memory_space<vmem>>, %arg12: memref<1x2048xf32, #tpu.memory_space<vmem>>, %arg13: memref<2048x128xbf16, #tpu.memory_space<vmem>>, %arg14: memref<1x128xf32, #tpu.memory_space<vmem>>, %arg15: memref<1x8x128xf32, #tpu.memory_space<vmem>>) attributes {dimension_semantics = [#tpu.dimension_semantics<parallel>, #tpu.dimension_semantics<arbitrary>], iteration_bounds = array<i64: 2, 2>, scalar_prefetch = 0 : i64, scratch_operands = 0 : i64, tpu.core_type = #tpu.core_type<tc>, window_params = [{transform_indices = @transform_0, window_bounds = array<i64: 1, 8, 128>}, {transform_indices = @transform_1, window_bounds = array<i64: 1, 1, 8>}, {pipeline_mode = #tpu.pipeline_mode<synchronous>, transform_indices = @transform_2, window_bounds = array<i64: 1, 128>}, {pipeline_mode = #tpu.pipeline_mode<synchronous>, transform_indices = @transform_3, window_bounds = array<i64: 1, 128>}, {transform_indices = @transform_4, window_bounds = array<i64: 1, 128, 256>}, {transform_indices = @transform_5, window_bounds = array<i64: 1, 128, 256>}, {transform_indices = @transform_6, window_bounds = array<i64: 1, 1, 128>}, {pipeline_mode = #tpu.pipeline_mode<synchronous>, transform_indices = @transform_7, window_bounds = array<i64: 1, 128>}, {pipeline_mode = #tpu.pipeline_mode<synchronous>, transform_indices = @transform_8, window_bounds = array<i64: 1, 128>}, {pipeline_mode = #tpu.pipeline_mode<synchronous>, transform_indices = @transform_9, window_bounds = array<i64: 128, 2048>}, {pipeline_mode = #tpu.pipeline_mode<synchronous>, transform_indices = @transform_10, window_bounds = array<i64: 1, 2048>}, {pipeline_mode = #tpu.pipeline_mode<synchronous>, transform_indices = @transform_11, window_bounds = array<i64: 2048, 128>}, {pipeline_mode = #tpu.pipeline_mode<synchronous>, transform_indices = @transform_12, window_bounds = array<i64: 1, 128>}, {transform_indices = @transform_13, window_bounds = array<i64: 1, 8, 128>}]} {
    %c0_i32 = arith.constant 0 : i32
    %0 = arith.cmpi eq, %arg1, %c0_i32 : i32
    %1 = arith.extui %0 : i1 to i32
    %c0_i32_0 = arith.constant 0 : i32
    %2 = arith.cmpi ne, %1, %c0_i32_0 : i32
    scf.if %2 {
      %c0_53 = arith.constant 0 : index
      %c0_54 = arith.constant 0 : index
      %c0_55 = arith.constant 0 : index
      %121 = vector.load %arg2[%c0_53, %c0_54, %c0_55] : memref<1x8x128xf32, #tpu.memory_space<vmem>>, vector<1x8x128xf32>
      %c0_56 = arith.constant 0 : index
      %c0_57 = arith.constant 0 : index
      %c0_58 = arith.constant 0 : index
      %122 = vector.load %arg15[%c0_56, %c0_57, %c0_58] : memref<1x8x128xf32, #tpu.memory_space<vmem>>, vector<1x8x128xf32>
      tpu.vector_store %arg15[%c0_56, %c0_57, %c0_58], %121 {strides = array<i32>} : memref<1x8x128xf32, #tpu.memory_space<vmem>>, vector<1x8x128xf32>,
    } else {
    }
    %c0 = arith.constant 0 : index
    %c0_1 = arith.constant 0 : index
    %c0_2 = arith.constant 0 : index
    %3 = vector.load %arg15[%c0, %c0_1, %c0_2] : memref<1x8x128xf32, #tpu.memory_space<vmem>>, vector<1x8x128xf32>
    %c0_3 = arith.constant 0 : index
    %c0_4 = arith.constant 0 : index
    %4 = vector.load %arg4[%c0_3, %c0_4] : memref<1x128xf32, #tpu.memory_space<vmem>>, vector<1x128xf32>
    %c0_5 = arith.constant 0 : index
    %c0_6 = arith.constant 0 : index
    %5 = vector.load %arg5[%c0_5, %c0_6] : memref<1x128xf32, #tpu.memory_space<vmem>>, vector<1x128xf32>
    %cst = arith.constant dense<0.000000e+00> : vector<1x8xf32>
    %6 = vector.multi_reduction <add>, %3, %cst [2] : vector<1x8x128xf32> to vector<1x8xf32>
    %7 = vector.shape_cast %6 : vector<1x8xf32> to vector<1x8x1xf32>
    %cst_7 = arith.constant 1.280000e+02 : f32
    %8 = vector.broadcast %cst_7 : f32 to vector<1x8x1xf32>
    %9 = arith.divf %7, %8 : vector<1x8x1xf32>
    %10 = vector.broadcast %9 : vector<1x8x1xf32> to vector<1x8x128xf32>
    %11 = arith.subf %3, %10 : vector<1x8x128xf32>
    %12 = arith.mulf %11, %11 : vector<1x8x128xf32>
    %cst_8 = arith.constant dense<0.000000e+00> : vector<1x8xf32>
    %13 = vector.multi_reduction <add>, %12, %cst_8 [2] : vector<1x8x128xf32> to vector<1x8xf32>
    %14 = vector.shape_cast %13 : vector<1x8xf32> to vector<1x8x1xf32>
    %cst_9 = arith.constant 1.280000e+02 : f32
    %15 = vector.broadcast %cst_9 : f32 to vector<1x8x1xf32>
    %16 = arith.divf %14, %15 : vector<1x8x1xf32>
    %17 = vector.broadcast %9 : vector<1x8x1xf32> to vector<1x8x128xf32>
    %18 = arith.subf %3, %17 : vector<1x8x128xf32>
    %cst_10 = arith.constant 9.99999997E-7 : f32
    %19 = vector.broadcast %cst_10 : f32 to vector<1x8x1xf32>
    %20 = arith.addf %16, %19 : vector<1x8x1xf32>
    %21 = math.rsqrt %20 : vector<1x8x1xf32>
    %22 = vector.broadcast %21 : vector<1x8x1xf32> to vector<1x8x128xf32>
    %23 = arith.mulf %18, %22 : vector<1x8x128xf32>
    %24 = vector.shape_cast %4 : vector<1x128xf32> to vector<1x1x128xf32>
    %25 = vector.broadcast %24 : vector<1x1x128xf32> to vector<1x8x128xf32>
    %26 = arith.mulf %23, %25 : vector<1x8x128xf32>
    %27 = vector.shape_cast %5 : vector<1x128xf32> to vector<1x1x128xf32>
    %28 = vector.broadcast %27 : vector<1x1x128xf32> to vector<1x8x128xf32>
    %29 = arith.addf %26, %28 : vector<1x8x128xf32>
    %30 = arith.truncf %29 : vector<1x8x128xf32> to vector<1x8x128xbf16>
    %cst_11 = arith.constant dense<0.000000e+00> : vector<1x8x8xf32>
    %31 = tpu.matmul %30, %30, %cst_11 {dimension_numbers = #tpu.dot_dimension_numbers<[2], [2], [1], [1], [0, 0, 0, 1, 1, 1], [0], [0]>} : vector<1x8x128xbf16>, vector<1x8x128xbf16>, vector<1x8x8xf32> -> vector<1x8x8xf32>
    %c0_12 = arith.constant 0 : index
    %c0_13 = arith.constant 0 : index
    %c0_14 = arith.constant 0 : index
    %32 = vector.load %arg3[%c0_12, %c0_13, %c0_14] : memref<1x1x8xf32, #tpu.memory_space<vmem>>, vector<1x1x8xf32>
    %33 = vector.broadcast %32 : vector<1x1x8xf32> to vector<1x8x8xf32>
    %34 = arith.addf %31, %33 : vector<1x8x8xf32>
    %cst_15 = arith.constant dense<0xFF800000> : vector<1x8xf32>
    %35 = vector.multi_reduction <maximumf>, %34, %cst_15 [2] : vector<1x8x8xf32> to vector<1x8xf32>
    %36 = vector.shape_cast %35 : vector<1x8xf32> to vector<1x8x1xf32>
    %37 = vector.broadcast %36 : vector<1x8x1xf32> to vector<1x8x8xf32>
    %38 = arith.subf %34, %37 : vector<1x8x8xf32>
    %39 = math.exp %38 : vector<1x8x8xf32>
    %cst_16 = arith.constant dense<0.000000e+00> : vector<1x8xf32>
    %40 = vector.multi_reduction <add>, %39, %cst_16 [2] : vector<1x8x8xf32> to vector<1x8xf32>
    %41 = vector.shape_cast %40 : vector<1x8xf32> to vector<1x8x1xf32>
    %42 = tpu.reciprocal %41 {approx = true} : vector<1x8x1xf32> -> vector<1x8x1xf32>
    %43 = vector.broadcast %42 : vector<1x8x1xf32> to vector<1x8x8xf32>
    %44 = arith.mulf %39, %43 : vector<1x8x8xf32>
    %45 = arith.truncf %44 : vector<1x8x8xf32> to vector<1x8x8xbf16>
    %cst_17 = arith.constant dense<0.000000e+00> : vector<1x8x128xf32>
    %46 = tpu.matmul %45, %30, %cst_17 {dimension_numbers = #tpu.dot_dimension_numbers<[2], [1], [1], [2], [0, 0, 0, 1, 1, 2], [0], [0]>} : vector<1x8x8xbf16>, vector<1x8x128xbf16>, vector<1x8x128xf32> -> vector<1x8x128xf32>
    %47 = arith.truncf %46 : vector<1x8x128xf32> to vector<1x8x128xbf16>
    %48 = vector.shape_cast %47 : vector<1x8x128xbf16> to vector<8x128xbf16>
    %49 = vector.shape_cast %30 : vector<1x8x128xbf16> to vector<8x128xbf16>
    %c0_18 = arith.constant 0 : index
    %c0_19 = arith.constant 0 : index
    %c0_20 = arith.constant 0 : index
    %50 = vector.load %arg6[%c0_18, %c0_19, %c0_20] : memref<1x128x256xbf16, #tpu.memory_space<vmem>>, vector<1x128x256xbf16>
    %51 = vector.shape_cast %50 : vector<1x128x256xbf16> to vector<128x256xbf16>
    %cst_21 = arith.constant dense<0.000000e+00> : vector<8x256xf32>
    %52 = tpu.matmul %48, %51, %cst_21 {dimension_numbers = #tpu.dot_dimension_numbers<[1], [0], [0], [1], [0, 0, 1, 1], [], []>} : vector<8x128xbf16>, vector<128x256xbf16>, vector<8x256xf32> -> vector<8x256xf32>
    %c0_22 = arith.constant 0 : index
    %c0_23 = arith.constant 0 : index
    %c0_24 = arith.constant 0 : index
    %53 = vector.load %arg7[%c0_22, %c0_23, %c0_24] : memref<1x128x256xbf16, #tpu.memory_space<vmem>>, vector<1x128x256xbf16>
    %54 = vector.shape_cast %53 : vector<1x128x256xbf16> to vector<128x256xbf16>
    %cst_25 = arith.constant dense<0.000000e+00> : vector<8x256xf32>
    %55 = tpu.matmul %49, %54, %cst_25 {dimension_numbers = #tpu.dot_dimension_numbers<[1], [0], [0], [1], [0, 0, 1, 1], [], []>} : vector<8x128xbf16>, vector<128x256xbf16>, vector<8x256xf32> -> vector<8x256xf32>
    %56 = arith.addf %52, %55 : vector<8x256xf32>
    %57 = vector.extract_strided_slice %56 {offsets = [0, 0], sizes = [8, 128], strides = [1, 1]} : vector<8x256xf32> to vector<8x128xf32>
    %58 = math.tanh %57 : vector<8x128xf32>
    %59 = vector.extract_strided_slice %56 {offsets = [0, 128], sizes = [8, 128], strides = [1, 1]} : vector<8x256xf32> to vector<8x128xf32>
    %c0_26 = arith.constant 0 : index
    %c0_27 = arith.constant 0 : index
    %c0_28 = arith.constant 0 : index
    %60 = vector.load %arg8[%c0_26, %c0_27, %c0_28] : memref<1x1x128xf32, #tpu.memory_space<vmem>>, vector<1x1x128xf32>
    %61 = vector.shape_cast %60 : vector<1x1x128xf32> to vector<1x128xf32>
    %62 = vector.broadcast %61 : vector<1x128xf32> to vector<8x128xf32>
    %63 = arith.addf %59, %62 : vector<8x128xf32>
    %64 = arith.negf %63 : vector<8x128xf32>
    %65 = math.exp %64 : vector<8x128xf32>
    %cst_29 = arith.constant 1.000000e+00 : f32
    %66 = vector.broadcast %cst_29 : f32 to vector<8x128xf32>
    %67 = arith.addf %66, %65 : vector<8x128xf32>
    %68 = arith.divf %66, %67 : vector<8x128xf32>
    %69 = arith.mulf %68, %58 : vector<8x128xf32>
    %70 = vector.shape_cast %69 : vector<8x128xf32> to vector<1x8x128xf32>
    %71 = arith.addf %70, %3 : vector<1x8x128xf32>
    %c0_30 = arith.constant 0 : index
    %c0_31 = arith.constant 0 : index
    %72 = vector.load %arg9[%c0_30, %c0_31] : memref<1x128xf32, #tpu.memory_space<vmem>>, vector<1x128xf32>
    %c0_32 = arith.constant 0 : index
    %c0_33 = arith.constant 0 : index
    %73 = vector.load %arg10[%c0_32, %c0_33] : memref<1x128xf32, #tpu.memory_space<vmem>>, vector<1x128xf32>
    %cst_34 = arith.constant dense<0.000000e+00> : vector<1x8xf32>
    %74 = vector.multi_reduction <add>, %71, %cst_34 [2] : vector<1x8x128xf32> to vector<1x8xf32>
    %75 = vector.shape_cast %74 : vector<1x8xf32> to vector<1x8x1xf32>
    %cst_35 = arith.constant 1.280000e+02 : f32
    %76 = vector.broadcast %cst_35 : f32 to vector<1x8x1xf32>
    %77 = arith.divf %75, %76 : vector<1x8x1xf32>
    %78 = vector.broadcast %77 : vector<1x8x1xf32> to vector<1x8x128xf32>
    %79 = arith.subf %71, %78 : vector<1x8x128xf32>
    %80 = arith.mulf %79, %79 : vector<1x8x128xf32>
    %cst_36 = arith.constant dense<0.000000e+00> : vector<1x8xf32>
    %81 = vector.multi_reduction <add>, %80, %cst_36 [2] : vector<1x8x128xf32> to vector<1x8xf32>
    %82 = vector.shape_cast %81 : vector<1x8xf32> to vector<1x8x1xf32>
    %cst_37 = arith.constant 1.280000e+02 : f32
    %83 = vector.broadcast %cst_37 : f32 to vector<1x8x1xf32>
    %84 = arith.divf %82, %83 : vector<1x8x1xf32>
    %85 = vector.broadcast %77 : vector<1x8x1xf32> to vector<1x8x128xf32>
    %86 = arith.subf %71, %85 : vector<1x8x128xf32>
    %cst_38 = arith.constant 9.99999997E-7 : f32
    %87 = vector.broadcast %cst_38 : f32 to vector<1x8x1xf32>
    %88 = arith.addf %84, %87 : vector<1x8x1xf32>
    %89 = math.rsqrt %88 : vector<1x8x1xf32>
    %90 = vector.broadcast %89 : vector<1x8x1xf32> to vector<1x8x128xf32>
    %91 = arith.mulf %86, %90 : vector<1x8x128xf32>
    %92 = vector.shape_cast %72 : vector<1x128xf32> to vector<1x1x128xf32>
    %93 = vector.broadcast %92 : vector<1x1x128xf32> to vector<1x8x128xf32>
    %94 = arith.mulf %91, %93 : vector<1x8x128xf32>
    %95 = vector.shape_cast %73 : vector<1x128xf32> to vector<1x1x128xf32>
    %96 = vector.broadcast %95 : vector<1x1x128xf32> to vector<1x8x128xf32>
    %97 = arith.addf %94, %96 : vector<1x8x128xf32>
    %98 = vector.shape_cast %97 : vector<1x8x128xf32> to vector<8x128xf32>
    %99 = arith.truncf %98 : vector<8x128xf32> to vector<8x128xbf16>
    %c0_39 = arith.constant 0 : index
    %c0_40 = arith.constant 0 : index
    %100 = vector.load %arg11[%c0_39, %c0_40] : memref<128x2048xbf16, #tpu.memory_space<vmem>>, vector<128x2048xbf16>
    %cst_41 = arith.constant dense<0.000000e+00> : vector<8x2048xf32>
    %101 = tpu.matmul %99, %100, %cst_41 {dimension_numbers = #tpu.dot_dimension_numbers<[1], [0], [0], [1], [0, 0, 1, 1], [], []>} : vector<8x128xbf16>, vector<128x2048xbf16>, vector<8x2048xf32> -> vector<8x2048xf32>
    %c0_42 = arith.constant 0 : index
    %c0_43 = arith.constant 0 : index
    %102 = vector.load %arg12[%c0_42, %c0_43] : memref<1x2048xf32, #tpu.memory_space<vmem>>, vector<1x2048xf32>
    %103 = vector.broadcast %102 : vector<1x2048xf32> to vector<8x2048xf32>
    %104 = arith.addf %101, %103 : vector<8x2048xf32>
    %cst_44 = arith.constant 0.000000e+00 : f32
    %105 = vector.broadcast %cst_44 : f32 to vector<8x2048xf32>
    %106 = arith.maximumf %104, %105 : vector<8x2048xf32>
    %107 = arith.truncf %106 : vector<8x2048xf32> to vector<8x2048xbf16>
    %c0_45 = arith.constant 0 : index
    %c0_46 = arith.constant 0 : index
    %108 = vector.load %arg13[%c0_45, %c0_46] : memref<2048x128xbf16, #tpu.memory_space<vmem>>, vector<2048x128xbf16>
    %cst_47 = arith.constant dense<0.000000e+00> : vector<8x128xf32>
    %109 = tpu.matmul %107, %108, %cst_47 {dimension_numbers = #tpu.dot_dimension_numbers<[1], [0], [0], [1], [0, 0, 1, 1], [], []>} : vector<8x2048xbf16>, vector<2048x128xbf16>, vector<8x128xf32> -> vector<8x128xf32>
    %c0_48 = arith.constant 0 : index
    %c0_49 = arith.constant 0 : index
    %110 = vector.load %arg14[%c0_48, %c0_49] : memref<1x128xf32, #tpu.memory_space<vmem>>, vector<1x128xf32>
    %111 = vector.broadcast %110 : vector<1x128xf32> to vector<8x128xf32>
    %112 = arith.addf %109, %111 : vector<8x128xf32>
    %113 = vector.shape_cast %112 : vector<8x128xf32> to vector<1x8x128xf32>
    %114 = arith.addf %71, %113 : vector<1x8x128xf32>
    %c1_i32 = arith.constant 1 : i32
    %115 = arith.cmpi slt, %arg1, %c1_i32 : i32
    %116 = arith.extui %115 : i1 to i32
    %c0_i32_50 = arith.constant 0 : i32
    %117 = arith.cmpi ne, %116, %c0_i32_50 : i32
    scf.if %117 {
      %c0_53 = arith.constant 0 : index
      %c0_54 = arith.constant 0 : index
      %c0_55 = arith.constant 0 : index
      %121 = vector.load %arg15[%c0_53, %c0_54, %c0_55] : memref<1x8x128xf32, #tpu.memory_space<vmem>>, vector<1x8x128xf32>
      tpu.vector_store %arg15[%c0_53, %c0_54, %c0_55], %114 {strides = array<i32>} : memref<1x8x128xf32, #tpu.memory_space<vmem>>, vector<1x8x128xf32>,
    } else {
    }
    %c1_i32_51 = arith.constant 1 : i32
    %118 = arith.cmpi eq, %arg1, %c1_i32_51 : i32
    %119 = arith.extui %118 : i1 to i32
    %c0_i32_52 = arith.constant 0 : i32
    %120 = arith.cmpi ne, %119, %c0_i32_52 : i32
    scf.if %120 {
      %cst_53 = arith.constant dense<0.000000e+00> : vector<1x8xf32>
      %121 = vector.multi_reduction <add>, %114, %cst_53 [2] : vector<1x8x128xf32> to vector<1x8xf32>
      %122 = vector.shape_cast %121 : vector<1x8xf32> to vector<1x8x1xf32>
      %cst_54 = arith.constant 1.280000e+02 : f32
      %123 = vector.broadcast %cst_54 : f32 to vector<1x8x1xf32>
      %124 = arith.divf %122, %123 : vector<1x8x1xf32>
      %125 = vector.broadcast %124 : vector<1x8x1xf32> to vector<1x8x128xf32>
      %126 = arith.subf %114, %125 : vector<1x8x128xf32>
      %127 = arith.mulf %126, %126 : vector<1x8x128xf32>
      %cst_55 = arith.constant dense<0.000000e+00> : vector<1x8xf32>
      %128 = vector.multi_reduction <add>, %127, %cst_55 [2] : vector<1x8x128xf32> to vector<1x8xf32>
      %129 = vector.shape_cast %128 : vector<1x8xf32> to vector<1x8x1xf32>
      %cst_56 = arith.constant 1.280000e+02 : f32
      %130 = vector.broadcast %cst_56 : f32 to vector<1x8x1xf32>
      %131 = arith.divf %129, %130 : vector<1x8x1xf32>
      %132 = vector.broadcast %124 : vector<1x8x1xf32> to vector<1x8x128xf32>
      %133 = arith.subf %114, %132 : vector<1x8x128xf32>
      %cst_57 = arith.constant 9.99999997E-7 : f32
      %134 = vector.broadcast %cst_57 : f32 to vector<1x8x1xf32>
      %135 = arith.addf %131, %134 : vector<1x8x1xf32>
      %136 = math.rsqrt %135 : vector<1x8x1xf32>
      %137 = vector.broadcast %136 : vector<1x8x1xf32> to vector<1x8x128xf32>
      %138 = arith.mulf %133, %137 : vector<1x8x128xf32>
      %139 = vector.shape_cast %4 : vector<1x128xf32> to vector<1x1x128xf32>
      %140 = vector.broadcast %139 : vector<1x1x128xf32> to vector<1x8x128xf32>
      %141 = arith.mulf %138, %140 : vector<1x8x128xf32>
      %142 = vector.shape_cast %5 : vector<1x128xf32> to vector<1x1x128xf32>
      %143 = vector.broadcast %142 : vector<1x1x128xf32> to vector<1x8x128xf32>
      %144 = arith.addf %141, %143 : vector<1x8x128xf32>
      %c0_58 = arith.constant 0 : index
      %c0_59 = arith.constant 0 : index
      %c0_60 = arith.constant 0 : index
      %145 = vector.load %arg15[%c0_58, %c0_59, %c0_60] : memref<1x8x128xf32, #tpu.memory_space<vmem>>, vector<1x8x128xf32>
      tpu.vector_store %arg15[%c0_58, %c0_59, %c0_60], %144 {strides = array<i32>} : memref<1x8x128xf32, #tpu.memory_space<vmem>>, vector<1x8x128xf32>,
    } else {
    }
    return
  }
  func.func @transform_0(%arg0: i32, %arg1: i32) -> (i32, i32, i32) {
    %c0_i32 = arith.constant 0 : i32
    %c0_i32_0 = arith.constant 0 : i32
    %c0_i32_1 = arith.constant 0 : i32
    return %arg0, %c0_i32, %c0_i32_0 : i32, i32, i32
  }
  func.func @transform_1(%arg0: i32, %arg1: i32) -> (i32, i32, i32) {
    %c0_i32 = arith.constant 0 : i32
    %c0_i32_0 = arith.constant 0 : i32
    %c0_i32_1 = arith.constant 0 : i32
    return %arg0, %c0_i32, %c0_i32_0 : i32, i32, i32
  }
  func.func @transform_2(%arg0: i32, %arg1: i32) -> (i32, i32) {
    %c0_i32 = arith.constant 0 : i32
    %c0_i32_0 = arith.constant 0 : i32
    %c0_i32_1 = arith.constant 0 : i32
    return %c0_i32, %c0_i32_0 : i32, i32
  }
  func.func @transform_3(%arg0: i32, %arg1: i32) -> (i32, i32) {
    %c0_i32 = arith.constant 0 : i32
    %c0_i32_0 = arith.constant 0 : i32
    %c0_i32_1 = arith.constant 0 : i32
    return %c0_i32, %c0_i32_0 : i32, i32
  }
  func.func @transform_4(%arg0: i32, %arg1: i32) -> (i32, i32, i32) {
    %c0_i32 = arith.constant 0 : i32
    %c0_i32_0 = arith.constant 0 : i32
    %c0_i32_1 = arith.constant 0 : i32
    return %arg1, %c0_i32, %c0_i32_0 : i32, i32, i32
  }
  func.func @transform_5(%arg0: i32, %arg1: i32) -> (i32, i32, i32) {
    %c0_i32 = arith.constant 0 : i32
    %c0_i32_0 = arith.constant 0 : i32
    %c0_i32_1 = arith.constant 0 : i32
    return %arg1, %c0_i32, %c0_i32_0 : i32, i32, i32
  }
  func.func @transform_6(%arg0: i32, %arg1: i32) -> (i32, i32, i32) {
    %c0_i32 = arith.constant 0 : i32
    %c0_i32_0 = arith.constant 0 : i32
    %c0_i32_1 = arith.constant 0 : i32
    return %arg1, %c0_i32, %c0_i32_0 : i32, i32, i32
  }
  func.func @transform_7(%arg0: i32, %arg1: i32) -> (i32, i32) {
    %c0_i32 = arith.constant 0 : i32
    %c0_i32_0 = arith.constant 0 : i32
    %c0_i32_1 = arith.constant 0 : i32
    return %c0_i32, %c0_i32_0 : i32, i32
  }
  func.func @transform_8(%arg0: i32, %arg1: i32) -> (i32, i32) {
    %c0_i32 = arith.constant 0 : i32
    %c0_i32_0 = arith.constant 0 : i32
    %c0_i32_1 = arith.constant 0 : i32
    return %c0_i32, %c0_i32_0 : i32, i32
  }
  func.func @transform_9(%arg0: i32, %arg1: i32) -> (i32, i32) {
    %c0_i32 = arith.constant 0 : i32
    %c0_i32_0 = arith.constant 0 : i32
    %c0_i32_1 = arith.constant 0 : i32
    return %c0_i32, %c0_i32_0 : i32, i32
  }
  func.func @transform_10(%arg0: i32, %arg1: i32) -> (i32, i32) {
    %c0_i32 = arith.constant 0 : i32
    %c0_i32_0 = arith.constant 0 : i32
    %c0_i32_1 = arith.constant 0 : i32
    return %c0_i32, %c0_i32_0 : i32, i32
  }
  func.func @transform_11(%arg0: i32, %arg1: i32) -> (i32, i32) {
    %c0_i32 = arith.constant 0 : i32
    %c0_i32_0 = arith.constant 0 : i32
    %c0_i32_1 = arith.constant 0 : i32
    return %c0_i32, %c0_i32_0 : i32, i32
  }
  func.func @transform_12(%arg0: i32, %arg1: i32) -> (i32, i32) {
    %c0_i32 = arith.constant 0 : i32
    %c0_i32_0 = arith.constant 0 : i32
    %c0_i32_1 = arith.constant 0 : i32
    return %c0_i32, %c0_i32_0 : i32, i32
  }
  func.func @transform_13(%arg0: i32, %arg1: i32) -> (i32, i32, i32) {
    %c0_i32 = arith.constant 0 : i32
    %c0_i32_0 = arith.constant 0 : i32
    %c0_i32_1 = arith.constant 0 : i32
    return %arg0, %c0_i32, %c0_i32_0 : i32, i32, i32
  }
}

</mosaic_0001>

<bundles_post_ra>
// kernel: tpu_custom_call.1
= control target key start
LH: loop header
LB: loop body
LE: loop exit
PB: predicated region body
PF: predicated region fallthrough
CT: control target
= control target key end

     0   :  { %s6206_s0 = inlined_call_operand.hbm [shape: f32[2,8,128], index: 0, kind: input, shape index: {}]   ;;  %s6207_s1 = inlined_call_operand.hbm [shape: f32[2,1,8], index: 1, kind: input, shape index: {}]   ;;  %s6208_s2 = inlined_call_operand.vmem [shape: f32[1,128], index: 2, kind: input, shape index: {}]   ;;  %s6209_s3 = inlined_call_operand.hbm [shape: f32[1,128], index: 3, kind: input, shape index: {}]   ;;  %s6210_s4 = inlined_call_operand.hbm [shape: bf16[2,128,256], index: 4, kind: input, shape index: {}]   ;;  %s6211_s5 = inlined_call_operand.hbm [shape: bf16[2,128,256], index: 5, kind: input, shape index: {}]   ;;  %s6212_s6 = inlined_call_operand.vmem [shape: f32[2,1,128], index: 6, kind: input, shape index: {}]   ;;  %s6213_s7 = inlined_call_operand.vmem [shape: f32[1,128], index: 7, kind: input, shape index: {}]   ;;  %s6214_s8 = inlined_call_operand.vmem [shape: f32[1,128], index: 8, kind: input, shape index: {}]   ;;  %s6215_s9 = inlined_call_operand.hbm [shape: bf16[128,2048], index: 9, kind: input, shape index: {}]   ;;  %s6216_s10 = inlined_call_operand.hbm [shape: f32[1,2048], index: 10, kind: input, shape index: {}]   ;;  %s6217_s11 = inlined_call_operand.hbm [shape: bf16[2048,128], index: 11, kind: input, shape index: {}]   ;;  %s6218_s12 = inlined_call_operand.vmem [shape: f32[1,128], index: 12, kind: input, shape index: {}]   ;;  %s6219_s13 = inlined_call_operand.hbm [shape: f32[2,8,128], index: 13, kind: output, shape index: {}]  }
   0x1   :  { %6234 = sst [smem:[#allocation35_spill]] %s6206_s0 }
   0x2   :  { %6235 = sst [smem:[#allocation36_spill]] %s6207_s1 }
   0x3   :  { %6236 = sst [smem:[#allocation37_spill]] %s6208_s2 }
   0x4   :  { %6237 = sst [smem:[#allocation38_spill]] %s6209_s3 }
   0x5   :  { %6238 = sst [smem:[#allocation39_spill]] %s6210_s4 }
   0x6   :  { %6239 = sst [smem:[#allocation40_spill]] %s6211_s5 }
   0x7   :  { %6240 = sst [smem:[#allocation41_spill]] %s6212_s6 }
   0x8   :  { %6241 = sst [smem:[#allocation42_spill]] %s6213_s7 }
   0x9   :  { %6242 = sst [smem:[#allocation43_spill]] %s6214_s8 }
   0xa   :  { %6243 = sst [smem:[#allocation44_spill]] %s6215_s9 }
   0xb   :  { %6244 = sst [smem:[#allocation45_spill]] %s6216_s10 }
   0xc   :  { %6245 = sst [smem:[#allocation46_spill]] %s6217_s11 }
   0xd   :  { %6246 = sst [smem:[#allocation47_spill]] %s6218_s12 }
   0xe   :  { %6247 = sst [smem:[#allocation48_spill]] %s6219_s13 }
   0xf   :  { %18 = vsyncpa [#allocation3], 0 }
  0x10   :  { %20 = vsyncpa [#allocation3 + $0x1], 0 }
  0x11   :  { %21 = vsyncpa [#allocation6], 0 }
  0x12   :  { %23 = vsyncpa [#allocation6 + $0x1], 0 }
  0x13   :  { %24 = vsyncpa [#allocation9], 0 }
  0x14   :  { %26 = vsyncpa [#allocation9 + $0x1], 0 }
  0x15   :  { %27 = vsyncpa [#allocation12], 0 }
  0x16   :  { %28 = vsyncpa [#allocation15], 0 }
  0x17   :  { %29 = vsyncpa [#allocation4], 0 }
  0x18   :  { %31 = vsyncpa [#allocation4 + $0x1], 0  ;;  %s5709_s25 = smov 0   ;;  %s5711_s26 = smov 0  }
  0x19   :  { %s5713_s27 = smov 0   ;;  %s5715_s28 = smov 0  }
  0x1a   :  { %s5717_s29 = smov 0   ;;  %s5719_s30 = smov 0  }
  0x1b   :  { %s5721_s14 = smov 0   ;;  %s5723_s15 = smov 0  }
  0x1c   :  { %s5725_s16 = smov 0   ;;  %s5727_s17 = smov 0  }
  0x1d   :  { %s5729_s18 = smov 0  }
  0x1e LB: > { %6248 = sst [smem:[#allocation24_spill]] %s5591_s26  ;;  %s5765_s19 = sadd.s32 4294967295, %s5627_s18   ;;  %s5627_s18 = sphi %s5729_s18, %s37_s18   ;;  %s5623_s17 = sphi %s5727_s17, %s6309_s17   ;;  %s5619_s16 = sphi %s5725_s16, %s6302_s16   ;;  %s5615_s15 = sphi %s5723_s15, %s6308_s15   ;;  %s5611_s14 = sphi %s5721_s14, %s6301_s14   ;;  %s5607_s30 = sphi %s5719_s30, %s6300_s30   ;;  %s5603_s29 = sphi %s5717_s29, %s6307_s29   ;;  %s5599_s28 = sphi %s5715_s28, %s6306_s28   ;;  %s5595_s27 = sphi %s5713_s27, %s6305_s27   ;;  %s5591_s26 = sphi %s5711_s26, %s6304_s26   ;;  %s5587_s25 = sphi %s5709_s25, %s6297_s25  }
  0x1f   : > { %6249 = sst [smem:[#allocation25_spill]] %s5607_s30  ;;  %p3582_p0 = scmp.ge.s32.totalorder %s5627_s18, 1 }
  0x20   : > { %6250 = sst [smem:[#allocation26_spill]] %s5611_s14  ;;  %p70_p1 = scmp.eq.s32.totalorder %s5765_s19, 0 }
  0x21   : > { %6251 = sst [smem:[#allocation27_spill]] %s5615_s15  ;;  %p378_p2 = scmp.lt.s32.totalorder %s5627_s18, 5 }
  0x22   : > { %6252 = sst [smem:[#allocation28_spill]] %s5619_s16  ;;  %s5629_s24 = smov [#allocation7]  }
  0x23   : > { %s6253_s3 = sld [smem:[#allocation38_spill]]  ;;  %p5773_p3 = pnand %p3582_p0, %p378_p2 }
  0x24   : > { %s395_s13 = sshll.u32 %s5629_s24, 4  ;;  %s6256_s9 = sld [smem:[#allocation44_spill]]  ;;  %s396_s13 = int_to_ptr.vmem [resolvable:$true] %s395_s13 }
  0x25   : > { %s6254_s23 = scalar_select %p5773_p3, 1, 0 }
  0x26   : > { %p5082_p4 = pneg %p5773_p3  ;;  %s5630_s24 = smov [#allocation11]  }
  0x27   : > { %6255 = sst [smem:[#allocation29_spill]] %s6254_s23  ;;  %s5631_s12 = smov 1024  }
  0x28   : > { %p5784_p5 = pnand %p5082_p4, %p70_p1  ;;  %s6221_s15 = smov 64  }
  0x29   : > { %s393_s22 = sshll.u32 %s6253_s3, 4  ;;  %s412_s3 = sshll.u32 %s5630_s24, 4  ;;  %s394_s22 = int_to_ptr.hbm [resolvable:$true] %s393_s22  ;;  %s413_s3 = int_to_ptr.vmem [resolvable:$true] %s412_s3 }
  0x2a   : > { %s410_s20 = sshll.u32 %s6256_s9, 4  ;;  %s46_s9 = sadd.s32 1, %s5619_s16  ;;  %s411_s20 = int_to_ptr.hbm [resolvable:$true] %s410_s20 }
  0x2b   : > { %5085 = dma.hbm_to_vmem [thread:$0]  (!%p5784_p5), %s394_s22, 16, %s396_s13, [#allocation6]  }
  0x2c   : > { %5088 = dma.hbm_to_vmem [thread:$0]  (!%p5784_p5), %s411_s20, 16384, %s413_s3, [#allocation12], %s5631_s12, %s5631_s12, %s6221_s15  }
  0x2d   : > { %p64_p6 = scmp.eq.s32.totalorder %s5627_s18, 0  ;;  %p5795_p7 = scmp.ge.s32.totalorder %s46_s9, 2 }
  0x2e   : > { %s150_s24 = sadd.s32 1, %s5595_s27  ;;  %p157_p8 = scmp.ne.s32.totalorder %s5595_s27, %s5591_s26 }
  0x2f   : > { %p163_p9 = scmp.ne.s32.totalorder %s5591_s26, %s5587_s25  ;;  %s6311_s9 = smov (%p5795_p7, %s46_s9), 0 }
  0x30   : > { %6259 = sst [smem:[#allocation30_spill]] %s6311_s9  ;;  %p5810_p10 = por %p157_p8, %p64_p6 }
  0x31   : > { %p5816_p11 = por %p163_p9, %p70_p1  ;;  %s147_s22 = ssub.s32 %s5619_s16, %s6311_s9 }
  0x32   : > { %p6229_p12 = scmp.lt.s32.totalorder %s5627_s18, 4  ;;  %p148_p13 = scmp.eq.s32.totalorder %s147_s22, 0 }
  0x33   : > { %s6228_s25 = sand.u32 1, %s5627_s18   ;;  %s493_s20 = sand.u32 1, %s5595_s27  }
  0x34   : > { %s5826_s12 = scalar_select %p148_p13, %s5595_s27, %s150_s24  }
  0x35   : > { %s3590_s15 = sshll.u32 %s493_s20, 7  ;;  %s4766_s7 = sshll.u32 %s5619_s16, 7 }
  0x36   : > { %6262 = sst [smem:[#allocation31_spill]] %s5826_s12  ;;  %s495_s23 = scalar_lea.vmem [#allocation8], %s3590_s15 }
  0x37   : > { %s6263_s4 = sld [smem:[#allocation39_spill]]  ;;  %s503_s1 = sshll.u32 %s495_s23, 4  ;;  %s504_s1 = int_to_ptr.vmem [resolvable:$true] %s503_s1 }
  0x38   : > { %p5836_p0 = pnand %p6229_p12, %p5810_p10  ;;  %s6265_s5 = sld [smem:[#allocation40_spill]] }
  0x39   : > { %s5845_s2 = scalar_lea.sflag [#allocation9], %s6228_s25  ;;  %s6226_s6 = smov 128  }
  0x3a   : > { %s517_s13 = scalar_lea.vmem [#allocation10], %s3590_s15  ;;  %s6267_s10 = sld [smem:[#allocation45_spill]] }
  0x3b   : > { %s6268_s11 = sld [smem:[#allocation46_spill]]  ;;  %s49_s25 = sadd.s32 1, %s5623_s17 }
  0x3c   : > { %s56_s15 = sadd.s32 1, %s5607_s30  ;;  %s6313_s25 = smov (!%p5795_p7, %s49_s25), %s5623_s17 }
  0x3d   : > { %s500_s14 = scalar_lea.hbm %s6263_s4, %s4766_s7  ;;  %s5853_s4 = sshll.u32 %s517_s13, 4 }
  0x3e   : > { %s501_s26 = sshll.u32 %s500_s14, 4  ;;  %s522_s20 = scalar_lea.hbm %s6265_s5, %s4766_s7  ;;  %s502_s26 = int_to_ptr.hbm [resolvable:$true] %s501_s26 }
  0x3f   : > { %s6227_s14 = smov 8   ;;  %s523_s23 = sshll.u32 %s522_s20, 4  ;;  %s5855_s23 = int_to_ptr.hbm [resolvable:$true] %s523_s23 }
  0x40   : > { %5104 = dma.hbm_to_vmem [thread:$0]  (!%p5836_p0), %s502_s26, 2048, %s504_s1, %s5845_s2, %s6226_s6, %s6226_s6, %s6227_s14  }
  0x41   : > { %6266 = sst [smem:[#allocation32_spill]] %s5853_s4  ;;  %s425_s24 = sshll.u32 %s6267_s10, 4  ;;  %s426_s24 = int_to_ptr.hbm [resolvable:$true] %s425_s24 }
  0x42   : > { %s5635_s1 = smov [#allocation13]   ;;  %s436_s13 = sshll.u32 %s6268_s11, 4  ;;  %s437_s13 = int_to_ptr.hbm [resolvable:$true] %s436_s13 }
  0x43   : > { %s427_s26 = sshll.u32 %s5635_s1, 4  ;;  %s5636_s7 = smov [#allocation14]   ;;  %s428_s26 = int_to_ptr.vmem [resolvable:$true] %s427_s26 }
  0x44   : > { %5091 = dma.hbm_to_vmem [thread:$0]  (!%p5784_p5), %s426_s24, 256, %s428_s26, [#allocation12]  }
  0x45   : > { %s438_s22 = sshll.u32 %s5636_s7, 4  ;;  %s5637_s6 = smov 4   ;;  %s439_s22 = int_to_ptr.vmem [resolvable:$true] %s438_s22 }
  0x46   : > { %s6269_s14 = smov 64   ;;  %s3581_s1 = sadd.s32 4294967294, %s5627_s18  }
  0x47   : > { %5094 = dma.hbm_to_vmem [thread:$0]  (!%p5784_p5), %s437_s13, 16384, %s439_s22, [#allocation15], %s6269_s14, %s6269_s14, %s5637_s6  }
  0x48   : > { %p63_p2 = scmp.ne.s32.totalorder %s5607_s30, %s5603_s29  ;;  %p69_p4 = scmp.ne.s32.totalorder %s5603_s29, %s5599_s28 }
  0x49   : > { %p51_p8 = scmp.ge.s32.totalorder %s6313_s25, 2  ;;  %p365_p9 = scmp.eq.s32.totalorder %s5765_s19, 3 }
  0x4a   : > { %p5883_p10 = por %p64_p6, %p63_p2  ;;  %p5889_p13 = por %p70_p1, %p69_p4 }
  0x4b   : > { %s6315_s25 = smov (%p51_p8, %s6313_s25), 0  ;;  %p5895_p5 = por %p365_p9, %p63_p2 }
  0x4c   : > { %6272 = sst [smem:[#allocation33_spill]] %s6315_s25  ;;  %p371_p7 = scmp.eq.s32.totalorder %s3581_s1, 3 }
  0x4d   : > { %s53_s6 = ssub.s32 %s5623_s17, %s6315_s25  ;;  %s455_s14 = sand.u32 1, %s5607_s30  }
  0x4e   : > { %p54_p6 = scmp.eq.s32.totalorder %s53_s6, 0  ;;  %p5902_p12 = por %p371_p7, %p69_p4 }
  0x4f   : > { %s3588_s20 = sshll.u32 %s455_s14, 3  ;;  %s3589_s7 = sshll.u32 %s5623_s17, 3 }
  0x50   : > { %s5907_s13 = scalar_select %p54_p6, %s5607_s30, %s56_s15  }
  0x51   : > { %s6276_s0 = sld [smem:[#allocation35_spill]]  ;;  %s459_s10 = scalar_lea.vmem [#allocation2], %s3588_s20 }
  0x52   : > { %6275 = sst [smem:[#allocation34_spill]] %s5907_s13  ;;  %s467_s11 = sshll.u32 %s459_s10, 4  ;;  %s468_s11 = int_to_ptr.vmem [resolvable:$true] %s467_s11 }
  0x53   : > { %s6277_s1 = sld [smem:[#allocation32_spill]]  ;;  %p6278_p2 = scmp.lt.s32.totalorder %s5627_s18, 4 }
  0x54   : > { %s6279_s16 = sld [smem:[#allocation36_spill]]  ;;  %s456_s30 = scalar_lea.sflag [#allocation3], %s455_s14 }
  0x55   : > { %p5096_p4 = pnand %p6278_p2, %p5883_p10  ;;  %s6280_s22 = sand.u32 1, %s5627_s18  }
  0x56   : > { %s6282_s10 = smov 128  }
  0x57   : > { %s463_s5 = scalar_lea.hbm %s6276_s0, %s3589_s7  ;;  %s477_s7 = scalar_lea.vmem [#allocation5], %s455_s14 }
  0x58   : > { %s465_s6 = sshll.u32 %s463_s5, 4  ;;  %s484_s20 = sshll.u32 %s477_s7, 4  ;;  %s466_s6 = int_to_ptr.hbm [resolvable:$true] %s465_s6  ;;  %s485_s20 = int_to_ptr.vmem [resolvable:$true] %s484_s20 }
  0x59   : > { %5098 = dma.hbm_to_vmem [thread:$0]  (!%p5096_p4), %s466_s6, 128, %s468_s11, %s456_s30  }
  0x5a   : > { %s480_s13 = scalar_lea.hbm %s6279_s16, %s5623_s17  ;;  %s475_s0 = scalar_lea.sflag [#allocation6], %s6280_s22 }
  0x5b   : > { %s482_s4 = sshll.u32 %s480_s13, 4  ;;  %s6281_s5 = smov 8   ;;  %s483_s4 = int_to_ptr.hbm [resolvable:$true] %s482_s4 }
  0x5c   : > { %5101 = dma.hbm_to_vmem [thread:$0]  (!%p5096_p4), %s483_s4, 16, %s485_s20, %s475_s0  }
  0x5d   : > { %s6283_s24 = int_to_ptr.vmem [resolvable:$true] %s6277_s1  ;;  %543 = sbr.rel (%p5773_p3) target bundleno = 2006 (0x7d6), region = 72 }
  0x5e   : > { %5107 = dma.hbm_to_vmem [thread:$0]  (!%p5836_p0), %s5855_s23, 2048, %s6283_s24, %s5845_s2, %s6282_s10, %s6282_s10, %s6281_s5  }
  0x5f   : > { %s5935_s11 = sand.u32 (!%p5773_p3), 1, %s5603_s29  }
  0x60   : > { %s3597_s30 = sshll.u32 (!%p5773_p3), %s5935_s11, 3  ;;  %s546_s16 = scalar_lea.sflag (!%p5773_p3), [#allocation3], %s5935_s11 }
  0x61   : > { %s549_s25 = scalar_lea.vmem (!%p5773_p3), [#allocation2], %s3597_s30 }
  0x62   : > { %5558 = dma.done.wait (%p5889_p13), %s546_s16, 128  }
  0x63   : > { %5560 = vsyncadd (%p5889_p13), %s546_s16, 4294967168  ;;  %s555_s0 = sand.u32 1, %s5765_s19   ;;  %s558_s12 = scalar_lea.vmem [#allocation5], %s5935_s11 }
  0x64   : > { %s556_s9 = scalar_lea.sflag [#allocation6], %s555_s0 }
  0x65   : > { %5562 = dma.done.wait (%p5889_p13), %s556_s9, 16  }
  0x66   : > { %5564 = vsyncadd (%p5889_p13), %s556_s9, 4294967280 }
  0x67   : > { %5566 = dma.done.wait (%p70_p1), [#allocation6], 16  }
  0x68   : > { %5568 = vsyncadd (%p70_p1), [#allocation6], 4294967280  ;;  %s6285_s2 = sld [smem:[#allocation24_spill]]  ;;  %s570_s13 = scalar_lea.sflag [#allocation9], %s555_s0 }
  0x6e   : > { %s571_s23 = sand.u32 1, %s6285_s2  }
  0x6f   : > { %s3599_s14 = sshll.u32 %s571_s23, 7 }
  0x70   : > { %s5954_s1 = scalar_lea.vmem [#allocation8], %s3599_s14 }
  0x71   : > { %5570 = dma.done.wait (%p5816_p11), %s570_s13, 4096  }
  0x72   : > { %5572 = vsyncadd (%p5816_p11), %s570_s13, 4294963200  ;;  %s5960_s21 = scalar_lea.vmem [#allocation10], %s3599_s14 }
  0x73   : > { %5574 = dma.done.wait (%p70_p1), [#allocation12], 16640  }
  0x74   : > { %5576 = vsyncadd (%p70_p1), [#allocation12], 4294950656 }
  0x75   : > { %5578 = dma.done.wait (%p70_p1), [#allocation15], 16384  }
  0x76   : > { %5580 = vsyncadd (%p70_p1), [#allocation15], 4294950912  ;;  %s6286_s6 = sld [smem:[#allocation26_spill]]  ;;  %s5978_s22 = scalar_lea.vmem [#allocation16], %s3597_s30 }
  0x77   : > { %s6287_s7 = sld [smem:[#allocation41_spill]] }
  0x7c   : > { %p659_p3 = scmp.lt.s32.totalorder %s6286_s6, 1  ;;  %p3605_p11 = scmp.ne.s32.totalorder %s6286_s6, 0 }
  0x7e   : > { %s5972_s15 = scalar_select %p659_p3, %s6286_s6, 1 }
  0x7f   : > { %666 = sbr.rel (%p3605_p11) target bundleno = 134 (0x86), region = 108 }
  0x80   : > { %s661_s20 = scalar_lea.vmem %s6287_s7, %s5972_s15 }
  0x84   : > { %v667_v0 = vld [vmem:[%s549_s25] sm:$0xff] }
  0x85   : > { %668 = vst [vmem:[%s5978_s22] sm:$0xff] %v667_v0 }
  0x86 PF: > { %v5638_v2 = vmov 128.0   ;;  %v3665_v3 = vld [vmem:[%s5960_s21 + $0x70] sm:$0xf]  ;;  %v4799_v4 = vld [vmem:[%s5960_s21 + $0x74] sm:$0xf0]  ;;  %s6288_s10 = sld [smem:[#allocation37_spill]] }
  0x87   : > { %5227 = vrcp.f32 %v5638_v2  ;;  %v4798_v5 = vld [vmem:[%s5960_s21 + $0x74] sm:$0xf]  ;;  %v3666_v6 = vor.u32 %v4799_v4, %v3665_v3  ;;  %v3667_v7 = vld [vmem:[%s5960_s21 + $0x78] sm:$0xf0]  ;;  %v3657_v19 = vld [vmem:[%s5960_s21 + $0x60] sm:$0xf] }
  0x88   : > { %v3670_v8 = vor.u32 %v4798_v5, %v3667_v7  ;;  %v4797_v20 = vld [vmem:[%s5960_s21 + $0x64] sm:$0xf0]  ;;  %v4796_v21 = vld [vmem:[%s5960_s21 + $0x64] sm:$0xf]  ;;  %v3659_v23 = vld [vmem:[%s5960_s21 + $0x68] sm:$0xf0] }
  0x89   : > { %871 = vmatpush.bf16.msra.mxu2 %v3666_v6  ;;  %v3658_v22 = vor.u32 %v4797_v20, %v3657_v19  ;;  %v3662_v24 = vor.u32 %v4796_v21, %v3659_v23  ;;  %v3649_v25 = vld [vmem:[%s5960_s21 + $0x50] sm:$0xf]  ;;  %v4795_v26 = vld [vmem:[%s5960_s21 + $0x54] sm:$0xf0]  ;;  %v4794_v27 = vld [vmem:[%s5960_s21 + $0x54] sm:$0xf] }
  0x8a   : > { %884 = vmatpush.bf16.msra.mxu3 %v3670_v8  ;;  %v3650_v28 = vor.u32 %v4795_v26, %v3649_v25  ;;  %v3651_v29 = vld [vmem:[%s5960_s21 + $0x58] sm:$0xf0]  ;;  %v3641_v31 = vld [vmem:[%s5960_s21 + $0x40] sm:$0xf]  ;;  %v4793_v32 = vld [vmem:[%s5960_s21 + $0x44] sm:$0xf0] }
  0x8b   : > { %v3654_v30 = vor.u32 %v4794_v27, %v3651_v29  ;;  %v4792_v33 = vld [vmem:[%s5960_s21 + $0x44] sm:$0xf]  ;;  %v3642_v34 = vor.u32 %v4793_v32, %v3641_v31  ;;  %v3643_v35 = vld [vmem:[%s5960_s21 + $0x48] sm:$0xf0]  ;;  %v3633_v37 = vld [vmem:[%s5960_s21 + $0x30] sm:$0xf] }
  0x8c   : > { %v5983_v1 = vld [vmem:[%s5978_s22] sm:$0xff]  ;;  %v3646_v36 = vor.u32 %v4792_v33, %v3643_v35  ;;  %v3625_v43 = vld [vmem:[%s5960_s21 + $0x20] sm:$0xf]  ;;  %v4789_v44 = vld [vmem:[%s5960_s21 + $0x24] sm:$0xf0]  ;;  %vm741_vm4 = vcmask 1043456  }
  0x8d   : > { %672 = vadd.xlane.f32.xlu0 %v5983_v1  ;;  %v5228_v9 = vpop.eup %5227  ;;  %872 = vmatpush.bf16.msra.mxu2 %v3658_v22  ;;  %v4791_v38 = vld [vmem:[%s5960_s21 + $0x34] sm:$0xf0]  ;;  %v4790_v39 = vld [vmem:[%s5960_s21 + $0x34] sm:$0xf]  ;;  %v3635_v41 = vld [vmem:[%s5960_s21 + $0x38] sm:$0xf0]  ;;  %v3626_v46 = vor.u32 %v4789_v44, %v3625_v43 }
  0x8e   : > { %v675_v10 = vmul.f32 128.0, %v5228_v9  ;;  %vm679_vm0 = vweird.f32 %v5228_v9  ;;  %885 = vmatpush.bf16.msra.mxu3 %v3662_v24  ;;  %v3634_v40 = vor.u32 %v4791_v38, %v3633_v37  ;;  %v3638_v42 = vor.u32 %v4790_v39, %v3635_v41  ;;  %v4788_v45 = vld [vmem:[%s5960_s21 + $0x24] sm:$0xf]  ;;  %v3627_v47 = vld [vmem:[%s5960_s21 + $0x28] sm:$0xf0]  ;;  %s6290_s9 = sld [smem:[#allocation42_spill]] }
  0x8f   : > { %v3630_v48 = vor.u32 %v4788_v45, %v3627_v47  ;;  %v3617_v49 = vld [vmem:[%s5960_s21 + $0x10] sm:$0xf]  ;;  %v4787_v50 = vld [vmem:[%s5960_s21 + $0x14] sm:$0xf0]  ;;  %v4786_v51 = vld [vmem:[%s5960_s21 + $0x14] sm:$0xf] }
  0x90   : > { %v676_v11 = vsub.f32 1.0, %v675_v10  ;;  %v3618_v52 = vor.u32 %v4787_v50, %v3617_v49  ;;  %v3619_v53 = vld [vmem:[%s5960_s21 + $0x18] sm:$0xf0]  ;;  %v3609_v55 = vld [vmem:[%s5960_s21] sm:$0xf]  ;;  %vm725_vm5 = vcmask 64512  }
  0x91   : > { %873 = vmatpush.bf16.msra.mxu2 %v3650_v28  ;;  %v3622_v54 = vor.u32 %v4786_v51, %v3619_v53  ;;  %v4785_v56 = vld [vmem:[%s5960_s21 + $0x4] sm:$0xf0]  ;;  %v4784_v57 = vld [vmem:[%s5960_s21 + $0x4] sm:$0xf]  ;;  %v3611_v59 = vld [vmem:[%s5960_s21 + $0x8] sm:$0xf0] }
  0x92   : > { %v677_v12 = vmul.f32 %v5228_v9, %v676_v11  ;;  %886 = vmatpush.bf16.msra.mxu3 %v3654_v30  ;;  %v3610_v58 = vor.u32 %v4785_v56, %v3609_v55  ;;  %v3614_v60 = vor.u32 %v4784_v57, %v3611_v59  ;;  %v6030_v7 = vld [vmem:[%s6288_s10] ss:$0 sm:$0xff]  ;;  %v6033_v10 = vld [vmem:[#allocation7] ss:$0 sm:$0xff]  ;;  %v3729_v30 = vld [vmem:[%s5954_s1 + $0x70] sm:$0xf] }
  0x93   : > { %v4783_v31 = vld [vmem:[%s5954_s1 + $0x74] sm:$0xf0]  ;;  %v4782_v32 = vld [vmem:[%s5954_s1 + $0x74] sm:$0xf]  ;;  %v3721_v35 = vld [vmem:[%s5954_s1 + $0x60] sm:$0xf] }
  0x94   : > { %v678_v13 = vadd.f32 %v5228_v9, %v677_v12  ;;  %v3730_v33 = vor.u32 %v4783_v31, %v3729_v30  ;;  %v4780_v38 = vld [vmem:[%s5954_s1 + $0x64] sm:$0xf]  ;;  %v3723_v39 = vld [vmem:[%s5954_s1 + $0x68] sm:$0xf0]  ;;  %v4779_v43 = vld [vmem:[%s5954_s1 + $0x54] sm:$0xf0] }
  0x95   : > { %874 = vmatpush.bf16.msra.mxu2 %v3642_v34  ;;  %v3731_v34 = vld [vmem:[%s5954_s1 + $0x78] sm:$0xf0]  ;;  %v3726_v41 = vor.u32 %v4780_v38, %v3723_v39  ;;  %v4778_v44 = vld [vmem:[%s5954_s1 + $0x54] sm:$0xf]  ;;  %v4777_v49 = vld [vmem:[%s5954_s1 + $0x44] sm:$0xf0] }
  0x96   : > { %v5990_v14 = vsel %vm679_vm0, %v5228_v9, %v678_v13  ;;  %887 = vmatpush.bf16.msra.mxu3 %v3646_v36  ;;  %v4781_v36 = vld [vmem:[%s5954_s1 + $0x64] sm:$0xf0]  ;;  %v3734_v37 = vor.u32 %v4782_v32, %v3731_v34  ;;  %v3715_v45 = vld [vmem:[%s5954_s1 + $0x58] sm:$0xf0]  ;;  %v4776_v50 = vld [vmem:[%s5954_s1 + $0x44] sm:$0xf] }
  0x97   : > { %v3718_v47 = vor.u32 %v4778_v44, %v3715_v45  ;;  %v3707_v51 = vld [vmem:[%s5954_s1 + $0x48] sm:$0xf0]  ;;  %v4775_v55 = vld [vmem:[%s5954_s1 + $0x34] sm:$0xf0]  ;;  %v4774_v56 = vld [vmem:[%s5954_s1 + $0x34] sm:$0xf] }
  0x98   : > { %v3710_v53 = vor.u32 %v4776_v50, %v3707_v51  ;;  %v3699_v57 = vld [vmem:[%s5954_s1 + $0x38] sm:$0xf0]  ;;  %v4920_v50 = vld [vmem:[#allocation11 + $0x3bc] sm:$0xf0]  ;;  %v4912_v51 = vld [vmem:[#allocation11 + $0x384] sm:$0xf] }
  0x99   : > { %875 = vmatpush.bf16.msra.mxu2 %v3634_v40  ;;  %v3722_v40 = vor.u32 %v4781_v36, %v3721_v35  ;;  %v3702_v59 = vor.u32 %v4774_v56, %v3699_v57  ;;  %s6291_s23 = sld [smem:[#allocation43_spill]] }
  0x9a   : > { %888 = vmatpush.bf16.msra.mxu3 %v3638_v42  ;;  %v3713_v42 = vld [vmem:[%s5954_s1 + $0x50] sm:$0xf]  ;;  %s6293_s21 = sld [smem:[#allocation26_spill]] }
  0x9d   : > { %876 = vmatpush.bf16.msra.mxu2 %v3626_v46  ;;  %v3714_v46 = vor.u32 %v4779_v43, %v3713_v42 }
  0x9e   : > { %889 = vmatpush.bf16.msra.mxu3 %v3630_v48  ;;  %v3705_v48 = vld [vmem:[%s5954_s1 + $0x40] sm:$0xf] }
  0xa0   : > { %p4760_p1 = scmp.ge.s32.totalorder %s6293_s21, 1 }
  0xa1   : > { %877 = vmatpush.bf16.msra.mxu2 %v3618_v52  ;;  %v3706_v52 = vor.u32 %v4777_v49, %v3705_v48 }
  0xa2   : > { %890 = vmatpush.bf16.msra.mxu3 %v3622_v54  ;;  %v3697_v54 = vld [vmem:[%s5954_s1 + $0x30] sm:$0xf] }
  0xa5   : > { %878 = vmatpush.bf16.msra.mxu2 %v3610_v58  ;;  %v3698_v58 = vor.u32 %v4775_v55, %v3697_v54  ;;  %v4194_v54 = vld [vmem:[#allocation11 + $0x388] sm:$0xf] }
  0xa6   : > { %891 = vmatpush.bf16.msra.mxu3 %v3614_v60  ;;  %v3689_v60 = vld [vmem:[%s5954_s1 + $0x20] sm:$0xf]  ;;  %v4921_v55 = vld [vmem:[#allocation11 + $0x3c4] sm:$0xf0] }
  0xa7   : > { %v4195_v57 = vor.u32 %v4921_v55, %v4194_v54  ;;  %v4841_v54 = vld [vmem:[#allocation11 + $0x144] sm:$0xf0]  ;;  %v4833_v55 = vld [vmem:[#allocation11 + $0x10c] sm:$0xf] }
 0x100   : > { %v673_v15 = vpop.xlane.xlu0 %672 }
 0x101   : > { %v681_v16 = vmul.f32 %v5990_v14, %v673_v15 }
 0x103   : > { %v5994_v17 = vsub.f32 %v5983_v1, %v681_v16  ;;  %v5222_v16 = vld [vmem:[%s558_s12] ss:$0 sm:$0xff] }
 0x105   : > { %v683_v18 = vmul.f32 %v5994_v17, %v5994_v17 }
 0x107   : > { %684 = vadd.xlane.f32.xlu0 %v683_v18 }
 0x17a   : > { %v685_v61 = vpop.xlane.xlu0 %684 }
 0x17b   : > { %v686_v62 = vmul.f32 %v685_v61, %v5990_v14  ;;  %v4773_v61 = vld [vmem:[%s5954_s1 + $0x24] sm:$0xf0] }
 0x17d   : > { %v687_v63 = vadd.f32 1e-06, %v686_v62  ;;  %v4772_v62 = vld [vmem:[%s5954_s1 + $0x24] sm:$0xf] }
 0x17f   : > { %5229 = vrsqrt.f32 %v687_v63  ;;  %vm694_vm2 = vweird.f32 %v687_v63 }
 0x185   : > { %v5230_v0 = vpop.eup %5229 }
 0x186   : > { %v689_v2 = vmul.f32 %v5230_v0, %v687_v63  ;;  %vm695_vm1 = vweird.f32 %v5230_v0  ;;  %v3691_v63 = vld [vmem:[%s5954_s1 + $0x28] sm:$0xf0] }
 0x187   : > { %vm696_vm3 = vmor %vm694_vm2, %vm695_vm1 }
 0x188   : > { %v690_v3 = vmul.f32 %v5230_v0, %v689_v2 }
 0x18a   : > { %v691_v4 = vmul.f32 0.5, %v690_v3  ;;  %v3694_v3 = vor.u32 %v4772_v62, %v3691_v63  ;;  %v4904_v62 = vld [vmem:[#allocation11 + $0x33c] sm:$0xf0]  ;;  %v4896_v63 = vld [vmem:[#allocation11 + $0x304] sm:$0xf] }
 0x18c   : > { %v692_v5 = vsub.f32 1.5, %v691_v4  ;;  %v3681_v4 = vld [vmem:[%s5954_s1 + $0x10] sm:$0xf] }
 0x18e   : > { %v693_v6 = vmul.f32 %v5230_v0, %v692_v5  ;;  %v4771_v5 = vld [vmem:[%s5954_s1 + $0x14] sm:$0xf0] }
 0x190   : > { %v697_v8 = vsel %vm696_vm3, %v5230_v0, %v693_v6  ;;  %v3690_v0 = vor.u32 %v4773_v61, %v3689_v60  ;;  %v4770_v6 = vld [vmem:[%s5954_s1 + $0x14] sm:$0xf]  ;;  %v4122_v60 = vld [vmem:[#allocation11 + $0x300] sm:$0xf] }
 0x191   : > { %v698_v9 = vmul.f32 %v697_v8, %v5994_v17  ;;  %v3683_v8 = vld [vmem:[%s5954_s1 + $0x18] sm:$0xf0] }
 0x193   : > { %v702_v11 = vmul.f32 %v6030_v7, %v698_v9  ;;  %v3682_v9 = vor.u32 %v4771_v5, %v3681_v4  ;;  %v4905_v4 = vld [vmem:[#allocation11 + $0x344] sm:$0xf0]  ;;  %v4897_v5 = vld [vmem:[#allocation11 + $0x30c] sm:$0xf] }
 0x195   : > { %v706_v12 = vadd.f32 %v6033_v10, %v702_v11  ;;  %v3686_v11 = vor.u32 %v4770_v6, %v3683_v8  ;;  %v4132_v8 = vld [vmem:[#allocation11 + $0x348] sm:$0xf0] }
 0x197   : > { %v707_v13 = vpack.c.bf16 %v706_v12, %v706_v12 }
 0x199   : > { %719 = vmatpush.bf16.xpose.msra.mxu0 %v707_v13  ;;  %879 = vmatmul.bf16.vlgmr.msra.gmra.mxu2 %v707_v13  ;;  %v743_v15 = vsel %vm741_vm4, %v707_v13, 0 }
 0x19a   : > { %892 = vmatmul.bf16.vlgmr.msra.gmra.mxu3 %v707_v13  ;;  %752 = vmatpush.bf16.msra.mxu1 %v743_v15 }
 0x19e   : > { %977 = vmatpush.bf16.msrb.mxu1 %v3730_v33 }
 0x1a0   : > { %720 = vmatmul.bf16.vlgmr.msra.gmra.mxu0 %v707_v13 }
 0x1a1   : > { %990 = vmatpush.bf16.msrb.mxu0 %v3734_v37 }
 0x1a2   : > { %978 = vmatpush.bf16.msrb.mxu1 %v3722_v40 }
 0x1a5   : > { %991 = vmatpush.bf16.msrb.mxu0 %v3726_v41 }
 0x1a6   : > { %979 = vmatpush.bf16.msrb.mxu1 %v3714_v46 }
 0x1a9   : > { %992 = vmatpush.bf16.msrb.mxu0 %v3718_v47 }
 0x1aa   : > { %980 = vmatpush.bf16.msrb.mxu1 %v3706_v52 }
 0x1ad   : > { %993 = vmatpush.bf16.msrb.mxu0 %v3710_v53  ;;  %v4188_v53 = vld [vmem:[#allocation11 + $0x3c0] sm:$0xf0] }
 0x1ae   : > { %981 = vmatpush.bf16.msrb.mxu1 %v3698_v58  ;;  %v4191_v56 = vor.u32 %v4912_v51, %v4188_v53  ;;  %v4913_v58 = vld [vmem:[#allocation11 + $0x38c] sm:$0xf]  ;;  %v3874_v53 = vld [vmem:[#allocation11 + $0x108] sm:$0xf] }
 0x1b0   : > { %1878 = vmatpush.bf16.msrb.mxu3 %v4191_v56  ;;  %v3876_v56 = vld [vmem:[#allocation11 + $0x148] sm:$0xf0] }
 0x1b1   : > { %994 = vmatpush.bf16.msrb.mxu0 %v3702_v59  ;;  %v4196_v59 = vld [vmem:[#allocation11 + $0x3c8] sm:$0xf0] }
 0x1b2   : > { %982 = vmatpush.bf16.msrb.mxu1 %v3690_v0  ;;  %v4199_v61 = vor.u32 %v4913_v58, %v4196_v59  ;;  %v4123_v0 = vor.u32 %v4904_v62, %v4122_v60  ;;  %v3875_v59 = vor.u32 %v4841_v54, %v3874_v53  ;;  %v3802_v60 = vld [vmem:[#allocation11 + $0x80] sm:$0xf]  ;;  %v4816_v62 = vld [vmem:[#allocation11 + $0x84] sm:$0xf]  ;;  %v4074_v53 = vld [vmem:[#allocation11 + $0x290] sm:$0xf] }
 0x1b3   : > { %v4890_v54 = vld [vmem:[#allocation11 + $0x2cc] sm:$0xf0] }
 0x1b5   : > { %995 = vmatpush.bf16.msrb.mxu0 %v3694_v3  ;;  %v4130_v3 = vld [vmem:[#allocation11 + $0x308] sm:$0xf] }
 0x1b6   : > { %983 = vmatpush.bf16.msrb.mxu1 %v3682_v9  ;;  %v4131_v6 = vor.u32 %v4905_v4, %v4130_v3  ;;  %v4058_v9 = vld [vmem:[#allocation11 + $0x280] sm:$0xf]  ;;  %v4817_v3 = vld [vmem:[#allocation11 + $0x8c] sm:$0xf] }
 0x1b7   : > { %v3812_v4 = vld [vmem:[#allocation11 + $0xc8] sm:$0xf0] }
 0x1b9   : > { %996 = vmatpush.bf16.msrb.mxu0 %v3686_v11  ;;  %v4888_v11 = vld [vmem:[#allocation11 + $0x2bc] sm:$0xf0] }
 0x21c   : > { %v6039_v18 = vpop.f32.mrf.mxu2 }
 0x21d   : > { %v6041_v19 = vpop.f32.mrf.mxu3  ;;  %v721_v17 = vpop.f32.mrf.mxu0 }
 0x21e   : > { %v722_v20 = vadd.f32 %v5222_v16, %v721_v17  ;;  %v3673_v16 = vld [vmem:[%s5954_s1] sm:$0xf]  ;;  %v4769_v17 = vld [vmem:[%s5954_s1 + $0x4] sm:$0xf0] }
 0x220   : > { %v726_v21 = vsel %vm725_vm5, %v722_v20, -inf }
 0x221   : > { %727 = vmax.xlane.f32.xlu1 %v726_v21  ;;  %v3674_v21 = vor.u32 %v4769_v17, %v3673_v16  ;;  %v4066_v16 = vld [vmem:[#allocation11 + $0x288] sm:$0xf]  ;;  %v4059_v17 = vor.u32 %v4888_v11, %v4058_v9  ;;  %v3815_v11 = vor.u32 %v4817_v3, %v3812_v4  ;;  %v4866_v3 = vld [vmem:[#allocation11 + $0x214] sm:$0xf] }
 0x223   : > { %984 = vmatpush.bf16.msrb.mxu1 %v3674_v21  ;;  %v4881_v21 = vld [vmem:[#allocation11 + $0x28c] sm:$0xf] }
 0x224   : > { %v882_v22 = vpop.f32.mrf.mxu2 }
 0x225   : > { %v895_v23 = vpop.f32.mrf.mxu3  ;;  %v723_v24 = vpop.f32.mrf.mxu0  ;;  %v3675_v22 = vld [vmem:[%s5954_s1 + $0x8] sm:$0xf0] }
 0x294   : > { %v728_v25 = vpop.xlane.xlu1 %727 }
 0x295   : > { %v729_v26 = vsub.f32 %v722_v20, %v728_v25  ;;  %v4768_v20 = vld [vmem:[%s5954_s1 + $0x4] sm:$0xf]  ;;  %s6292_s1 = sld [smem:[#allocation47_spill]] }
 0x296   : > { %v3678_v23 = vor.u32 %v4768_v20, %v3675_v22  ;;  %v4889_v20 = vld [vmem:[#allocation11 + $0x2c4] sm:$0xf0]  ;;  %v4068_v22 = vld [vmem:[#allocation11 + $0x2c8] sm:$0xf0] }
 0x297   : > { %v730_v27 = vmul.f32 1.442695, %v729_v26 }
 0x298   : > { %997 = vmatpush.bf16.msrb.mxu0 %v3678_v23 }
 0x299   : > { %5231 = vpow2.f32 %v730_v27  ;;  %v5223_v27 = vld [vmem:[%s661_s20] ss:$0 sm:$0xff] }
 0x29c   : > { %1904 = vmatpush.bf16.msra.mxu0 %v4199_v61  ;;  %v4824_v61 = vld [vmem:[#allocation11 + $0xbc] sm:$0xf0] }
 0x29f   : > { %v5232_v28 = vpop.eup %5231 }
 0x2a0   : > { %v732_v29 = vsel %vm725_vm5, %v5232_v28, 0.0 }
 0x2a1   : > { %733 = vadd.xlane.f32.xlu1 %v732_v29 }
 0x314   : > { %v734_v2 = vpop.xlane.xlu1 %733 }
 0x315   : > { %5233 = vrcp.f32 %v734_v2 }
 0x31b   : > { %v5234_v12 = vpop.eup %5233 }
 0x31c   : > { %v736_v13 = vmul.f32 %v5234_v12, %v5232_v28  ;;  %v4135_v12 = vor.u32 %v4897_v5, %v4132_v8  ;;  %v3803_v5 = vor.u32 %v4824_v61, %v3802_v60 }
 0x31e   : > { %v737_v15 = vpack.c.bf16 %v736_v13, %v736_v13  ;;  %v4880_v13 = vld [vmem:[#allocation11 + $0x284] sm:$0xf]  ;;  %1905 = vmatpush.bf16.msra.mxu0 %v4135_v12 }
 0x320   : > { %3606 = vmatmul.msk.bf16.vlgmr.msra.gmra.mxu1 %vm725_vm5, %v737_v15  ;;  %v4060_v15 = vld [vmem:[#allocation11 + $0x2c0] sm:$0xf0] }
 0x321   : > { %1891 = vmatpush.bf16.msra.mxu1 %v4195_v57  ;;  %v4063_v23 = vor.u32 %v4880_v13, %v4060_v15 }
 0x325   : > { %1892 = vmatpush.bf16.msra.mxu1 %v4131_v6 }
 0x39d   : > { %v754_v24 = vpop.f32.mrf.mxu1 }
 0x39e   : > { %v758_v25 = vpack.c.bf16 %v754_v24, %v754_v24  ;;  %v4067_v24 = vor.u32 %v4889_v20, %v4066_v16  ;;  %v3738_v16 = vld [vmem:[#allocation11] sm:$0xf]  ;;  %v4800_v20 = vld [vmem:[#allocation11 + $0x4] sm:$0xf] }
 0x3a0   : > { %985 = vmatmul.bf16.vlgmr.msrb.gmra.mxu1 %v758_v25  ;;  %998 = vmatmul.bf16.vlgmr.msrb.gmra.mxu0 %v758_v25  ;;  %v3994_v25 = vld [vmem:[#allocation11 + $0x200] sm:$0xf] }
 0x3a1   : > { %1893 = vmatpush.bf16.msra.mxu1 %v4067_v24  ;;  %v4809_v24 = vld [vmem:[#allocation11 + $0x44] sm:$0xf0] }
 0x3a5   : > { %v756_v26 = vpop.f32.mrf.mxu1 }
 0x3a6   : > { %v4872_v26 = vld [vmem:[#allocation11 + $0x23c] sm:$0xf0] }
 0x41d   : > { %v986_v28 = vpop.f32.mrf.mxu1  ;;  %v999_v29 = vpop.f32.mrf.mxu0 }
 0x41e   : > { %v1000_v30 = vadd.f32 %v999_v29, %v6041_v19  ;;  %v987_v38 = vadd.f32 %v986_v28, %v6039_v18  ;;  %v4186_v18 = vld [vmem:[#allocation11 + $0x380] sm:$0xf]  ;;  %v4071_v28 = vor.u32 %v4881_v21, %v4068_v22  ;;  %v3996_v29 = vld [vmem:[#allocation11 + $0x240] sm:$0xf0] }
 0x41f   : > { %v4187_v52 = vor.u32 %v4920_v50, %v4186_v18  ;;  %v4840_v18 = vld [vmem:[#allocation11 + $0x13c] sm:$0xf0]  ;;  %v4832_v50 = vld [vmem:[#allocation11 + $0x104] sm:$0xf] }
 0x420   : > { %v1008_v31 = vadd.f32 %v5223_v27, %v1000_v30  ;;  %v4864_v27 = vld [vmem:[#allocation11 + $0x204] sm:$0xf]  ;;  %v4002_v30 = vld [vmem:[#allocation11 + $0x208] sm:$0xf]  ;;  %1906 = vmatpush.bf16.msra.mxu0 %v4071_v28  ;;  %v3748_v28 = vld [vmem:[#allocation11 + $0x48] sm:$0xf0] }
 0x421   : > { %1865 = vmatpush.bf16.msrb.mxu2 %v4187_v52  ;;  %v3868_v52 = vld [vmem:[#allocation11 + $0x140] sm:$0xf0] }
 0x422   : > { %v3735_v32 = vmul.f32 -1.442695, %v1008_v31  ;;  %v4873_v31 = vld [vmem:[#allocation11 + $0x244] sm:$0xf0]  ;;  %v3871_v58 = vor.u32 %v4832_v50, %v3868_v52  ;;  %v3740_v22 = vld [vmem:[#allocation11 + $0x40] sm:$0xf0] }
 0x423   : > { %v4148_v50 = vld [vmem:[#allocation11 + $0x358] sm:$0xf0] }
 0x424   : > { %5235 = vpow2.f32 %v3735_v32  ;;  %v4865_v32 = vld [vmem:[#allocation11 + $0x20c] sm:$0xf] }
 0x425   : > { %v988_v33 = vpop.f32.mrf.mxu1  ;;  %v1001_v34 = vpop.f32.mrf.mxu0  ;;  %1866 = vmatpush.bf16.msrb.mxu2 %v4123_v0  ;;  %v3810_v0 = vld [vmem:[#allocation11 + $0x88] sm:$0xf] }
 0x426   : > { %v4004_v33 = vld [vmem:[#allocation11 + $0x248] sm:$0xf0]  ;;  %v3995_v34 = vor.u32 %v4872_v26, %v3994_v25  ;;  %v3743_v25 = vor.u32 %v4800_v20, %v3740_v22  ;;  %v4858_v20 = vld [vmem:[#allocation11 + $0x1cc] sm:$0xf0] }
 0x429   : > { %1867 = vmatpush.bf16.msrb.mxu2 %v4059_v17  ;;  %v4808_v17 = vld [vmem:[#allocation11 + $0x3c] sm:$0xf0] }
 0x42a   : > { %v5236_v35 = vpop.eup %5235  ;;  %v3739_v21 = vor.u32 %v4808_v17, %v3738_v16  ;;  %v3946_v17 = vld [vmem:[#allocation11 + $0x190] sm:$0xf] }
 0x42b   : > { %v1012_v36 = vadd.f32 1.0, %v5236_v35  ;;  %v3999_v35 = vor.u32 %v4864_v27, %v3996_v29  ;;  %v4801_v27 = vld [vmem:[#allocation11 + $0xc] sm:$0xf]  ;;  %v4202_v29 = vld [vmem:[#allocation11 + $0x390] sm:$0xf]  ;;  %v3947_v22 = vor.u32 %v4858_v20, %v3946_v17 }
 0x42c   : > { %v5225_v17 = vld [vmem:[%s6291_s23] ss:$0 sm:$0xff] }
 0x42d   : > { %5237 = vrcp.f32 %v1012_v36  ;;  %v1024_v41 = vand.u32 2147483648, %v1012_v36  ;;  %v1022_v43 = vand.u32 2147483647, %v1012_v36  ;;  %vm1018_vm7 = vweird.f32 %v1012_v36  ;;  %1868 = vmatpush.bf16.msrb.mxu2 %v3995_v34 }
 0x42e   : > { %5239 = vtanh.f32 %v987_v38  ;;  %v4856_v38 = vld [vmem:[#allocation11 + $0x1bc] sm:$0xf0] }
 0x42f   : > { %v1025_v19 = vor.u32 1.1754944e-38, %v1024_v41  ;;  %vm1023_vm9 = vcmp.eq.f32.partialorder %v1022_v43, 8.507059e+37  ;;  %v3932_v41 = vld [vmem:[#allocation11 + $0x1c0] sm:$0xf0]  ;;  %v4857_v43 = vld [vmem:[#allocation11 + $0x1c4] sm:$0xf0] }
 0x433   : > { %v5238_v37 = vpop.eup %5237 }
 0x434   : > { %v1014_v39 = vmul.f32 %v5238_v37, %v1012_v36  ;;  %vm1019_vm6 = vweird.f32 %v5238_v37  ;;  %v5240_v46 = vpop.eup %5239  ;;  %v4003_v36 = vor.u32 %v4873_v31, %v4002_v30  ;;  %v3751_v30 = vor.u32 %v4801_v27, %v3748_v28  ;;  %v4922_v31 = vld [vmem:[#allocation11 + $0x3cc] sm:$0xf0]  ;;  %v4851_v28 = vld [vmem:[#allocation11 + $0x19c] sm:$0xf] }
 0x435   : > { %vm1020_vm8 = vmor %vm1018_vm7, %vm1019_vm6  ;;  %v4203_v34 = vor.u32 %v4922_v31, %v4202_v29  ;;  %v3956_v29 = vld [vmem:[#allocation11 + $0x1d8] sm:$0xf0]  ;;  %v3882_v31 = vld [vmem:[#allocation11 + $0x110] sm:$0xf] }
 0x436   : > { %v1015_v40 = vsub.f32 1.0, %v1014_v39  ;;  %v4848_v39 = vld [vmem:[#allocation11 + $0x184] sm:$0xf]  ;;  %1894 = vmatpush.bf16.msra.mxu1 %v4003_v36  ;;  %v4210_v36 = vld [vmem:[#allocation11 + $0x398] sm:$0xf] }
 0x438   : > { %v1016_v42 = vmul.f32 %v5238_v37, %v1015_v40  ;;  %v4007_v40 = vor.u32 %v4865_v32, %v4004_v33  ;;  %v4914_v32 = vld [vmem:[#allocation11 + $0x394] sm:$0xf] }
 0x439   : > { %v4204_v33 = vld [vmem:[#allocation11 + $0x3d0] sm:$0xf0] }
 0x43a   : > { %v1017_v44 = vadd.f32 %v5238_v37, %v1016_v42  ;;  %v3938_v42 = vld [vmem:[#allocation11 + $0x188] sm:$0xf]  ;;  %1907 = vmatpush.bf16.msra.mxu0 %v4007_v40  ;;  %v4212_v40 = vld [vmem:[#allocation11 + $0x3d8] sm:$0xf0] }
 0x43c   : > { %v1021_v45 = vsel %vm1020_vm8, %v5238_v37, %v1017_v44  ;;  %v3930_v37 = vld [vmem:[#allocation11 + $0x180] sm:$0xf]  ;;  %v4849_v44 = vld [vmem:[#allocation11 + $0x18c] sm:$0xf] }
 0x43d   : > { %v1026_v47 = vsel %vm1023_vm9, %v1025_v19, %v1021_v45  ;;  %v3940_v19 = vld [vmem:[#allocation11 + $0x1c8] sm:$0xf0]  ;;  %v3931_v45 = vor.u32 %v4856_v38, %v3930_v37  ;;  %v4923_v37 = vld [vmem:[#allocation11 + $0x3d4] sm:$0xf0]  ;;  %v4915_v38 = vld [vmem:[#allocation11 + $0x39c] sm:$0xf] }
 0x43e   : > { %v1028_v48 = vmul.f32 %v5240_v46, %v1026_v47  ;;  %v3935_v46 = vor.u32 %v4848_v39, %v3932_v41  ;;  %v3939_v47 = vor.u32 %v4857_v43, %v3938_v42  ;;  %v3943_v51 = vor.u32 %v4849_v44, %v3940_v19  ;;  %v4138_v41 = vld [vmem:[#allocation11 + $0x310] sm:$0xf]  ;;  %v4898_v19 = vld [vmem:[#allocation11 + $0x314] sm:$0xf] }
 0x43f   : > { %1869 = vmatpush.bf16.msrb.mxu2 %v3931_v45  ;;  %v4211_v39 = vor.u32 %v4923_v37, %v4210_v36  ;;  %v4906_v42 = vld [vmem:[#allocation11 + $0x34c] sm:$0xf0]  ;;  %v4215_v43 = vor.u32 %v4915_v38, %v4212_v40  ;;  %v4140_v45 = vld [vmem:[#allocation11 + $0x350] sm:$0xf0]  ;;  %v3890_v36 = vld [vmem:[#allocation11 + $0x118] sm:$0xf] }
 0x440   : > { %v6086_v49 = vadd.f32 %v1028_v48, %v5983_v1  ;;  %v4124_v1 = vld [vmem:[#allocation11 + $0x340] sm:$0xf0]  ;;  %v3866_v48 = vld [vmem:[#allocation11 + $0x100] sm:$0xf]  ;;  %1895 = vmatpush.bf16.msra.mxu1 %v3939_v47  ;;  %1908 = vmatpush.bf16.msra.mxu0 %v3943_v51  ;;  %v4139_v44 = vor.u32 %v4906_v42, %v4138_v41  ;;  %v4143_v47 = vor.u32 %v4898_v19, %v4140_v45  ;;  %v4843_v37 = vld [vmem:[#allocation11 + $0x154] sm:$0xf0] }
 0x441   : > { %v4127_v2 = vor.u32 %v4896_v63, %v4124_v1  ;;  %v3867_v57 = vor.u32 %v4840_v18, %v3866_v48  ;;  %v3879_v63 = vor.u32 %v4833_v55, %v3876_v56  ;;  %v3804_v1 = vld [vmem:[#allocation11 + $0xc0] sm:$0xf0]  ;;  %v4907_v48 = vld [vmem:[#allocation11 + $0x354] sm:$0xf0]  ;;  %v4899_v18 = vld [vmem:[#allocation11 + $0x31c] sm:$0xf]  ;;  %v4075_v56 = vor.u32 %v4890_v54, %v4074_v53 }
 0x442   : > { %1032 = vadd.xlane.f32.xlu2 %v6086_v49  ;;  %v3807_v6 = vor.u32 %v4816_v62, %v3804_v1  ;;  %v4151_v52 = vor.u32 %v4899_v18, %v4148_v50  ;;  %v4882_v55 = vld [vmem:[#allocation11 + $0x294] sm:$0xf]  ;;  %v4883_v62 = vld [vmem:[#allocation11 + $0x29c] sm:$0xf]  ;;  %v3754_v54 = vld [vmem:[#allocation11 + $0x10] sm:$0xf] }
 0x443   : > { %1879 = vmatpush.bf16.msrb.mxu3 %v4127_v2  ;;  %v4825_v2 = vld [vmem:[#allocation11 + $0xc4] sm:$0xf0]  ;;  %1870 = vmatpush.bf16.msrb.mxu2 %v3867_v57  ;;  %v4076_v57 = vld [vmem:[#allocation11 + $0x2d0] sm:$0xf0]  ;;  %v4835_v40 = vld [vmem:[#allocation11 + $0x11c] sm:$0xf] }
 0x444   : > { %1896 = vmatpush.bf16.msra.mxu1 %v3875_v59  ;;  %v3811_v8 = vor.u32 %v4825_v2, %v3810_v0  ;;  %1909 = vmatpush.bf16.msra.mxu0 %v3879_v63  ;;  %v4891_v59 = vld [vmem:[#allocation11 + $0x2d4] sm:$0xf0]  ;;  %v4079_v60 = vor.u32 %v4882_v55, %v4076_v57  ;;  %v4084_v63 = vld [vmem:[#allocation11 + $0x2d8] sm:$0xf0]  ;;  %v4010_v0 = vld [vmem:[#allocation11 + $0x210] sm:$0xf] }
 0x445   : > { %v4087_v1 = vor.u32 %v4883_v62, %v4084_v63  ;;  %v4874_v2 = vld [vmem:[#allocation11 + $0x24c] sm:$0xf0]  ;;  %v3892_v41 = vld [vmem:[#allocation11 + $0x158] sm:$0xf0]  ;;  %v4818_v19 = vld [vmem:[#allocation11 + $0x94] sm:$0xf] }
 0x446   : > { %v4011_v4 = vor.u32 %v4874_v2, %v4010_v0  ;;  %v3895_v42 = vor.u32 %v4835_v40, %v3892_v41  ;;  %v4810_v55 = vld [vmem:[#allocation11 + $0x4c] sm:$0xf0]  ;;  %v4803_v63 = vld [vmem:[#allocation11 + $0x1c] sm:$0xf]  ;;  %v4909_v40 = vld [vmem:[#allocation11 + $0x364] sm:$0xf0] }
 0x447   : > { %1880 = vmatpush.bf16.msrb.mxu3 %v4063_v23  ;;  %1871 = vmatpush.bf16.msrb.mxu2 %v3803_v5  ;;  %v3746_v23 = vld [vmem:[#allocation11 + $0x8] sm:$0xf]  ;;  %v4012_v5 = vld [vmem:[#allocation11 + $0x250] sm:$0xf0]  ;;  %v3755_v57 = vor.u32 %v4810_v55, %v3754_v54  ;;  %v4901_v41 = vld [vmem:[#allocation11 + $0x32c] sm:$0xf] }
 0x448   : > { %1897 = vmatpush.bf16.msra.mxu1 %v3811_v8  ;;  %1910 = vmatpush.bf16.msra.mxu0 %v3815_v11  ;;  %v3747_v26 = vor.u32 %v4809_v24, %v3746_v23  ;;  %v4875_v8 = vld [vmem:[#allocation11 + $0x254] sm:$0xf0]  ;;  %v3948_v23 = vld [vmem:[#allocation11 + $0x1d0] sm:$0xf0] }
 0x449   : > { %v3954_v24 = vld [vmem:[#allocation11 + $0x198] sm:$0xf] }
 0x44b   : > { %1881 = vmatpush.bf16.msrb.mxu3 %v3999_v35  ;;  %1872 = vmatpush.bf16.msrb.mxu2 %v3739_v21  ;;  %v4207_v35 = vor.u32 %v4914_v32, %v4204_v33  ;;  %v4850_v21 = vld [vmem:[#allocation11 + $0x194] sm:$0xf]  ;;  %v4842_v32 = vld [vmem:[#allocation11 + $0x14c] sm:$0xf0] }
 0x44c   : > { %1898 = vmatpush.bf16.msra.mxu1 %v3747_v26  ;;  %1911 = vmatpush.bf16.msra.mxu0 %v3751_v30  ;;  %v3951_v26 = vor.u32 %v4850_v21, %v3948_v23  ;;  %v3959_v30 = vor.u32 %v4851_v28, %v3956_v29  ;;  %v4834_v33 = vld [vmem:[#allocation11 + $0x114] sm:$0xf]  ;;  %v4924_v23 = vld [vmem:[#allocation11 + $0x3dc] sm:$0xf0]  ;;  %v4925_v28 = vld [vmem:[#allocation11 + $0x3e4] sm:$0xf0] }
 0x44d   : > { %v4917_v29 = vld [vmem:[#allocation11 + $0x3ac] sm:$0xf] }
 0x44f   : > { %1882 = vmatpush.bf16.msrb.mxu3 %v3935_v46  ;;  %1917 = vmatpush.bf16.msra.mxu2 %v4203_v34  ;;  %v4146_v46 = vld [vmem:[#allocation11 + $0x318] sm:$0xf]  ;;  %v3883_v34 = vor.u32 %v4842_v32, %v3882_v31 }
 0x450   : > { %1943 = vmatpush.bf16.msrb.mxu1 %v4211_v39  ;;  %1956 = vmatpush.bf16.msrb.mxu0 %v4215_v43  ;;  %v4147_v51 = vor.u32 %v4907_v48, %v4146_v46  ;;  %v3891_v39 = vor.u32 %v4843_v37, %v3890_v36  ;;  %v3818_v43 = vld [vmem:[#allocation11 + $0x90] sm:$0xf]  ;;  %v3820_v46 = vld [vmem:[#allocation11 + $0xd0] sm:$0xf0]  ;;  %v4827_v48 = vld [vmem:[#allocation11 + $0xd4] sm:$0xf0] }
 0x451   : > { %v3823_v18 = vor.u32 %v4818_v19, %v3820_v46  ;;  %v4090_v19 = vld [vmem:[#allocation11 + $0x2a0] sm:$0xf] }
 0x453   : > { %1883 = vmatpush.bf16.msrb.mxu3 %v3871_v58  ;;  %1918 = vmatpush.bf16.msra.mxu2 %v4139_v44  ;;  %v4082_v58 = vld [vmem:[#allocation11 + $0x298] sm:$0xf]  ;;  %v4826_v44 = vld [vmem:[#allocation11 + $0xcc] sm:$0xf0] }
 0x454   : > { %1944 = vmatpush.bf16.msrb.mxu1 %v4147_v51  ;;  %v4083_v61 = vor.u32 %v4891_v59, %v4082_v58  ;;  %1957 = vmatpush.bf16.msrb.mxu0 %v4151_v52  ;;  %v3819_v45 = vor.u32 %v4826_v44, %v3818_v43  ;;  %v4819_v51 = vld [vmem:[#allocation11 + $0x9c] sm:$0xf]  ;;  %v3756_v58 = vld [vmem:[#allocation11 + $0x50] sm:$0xf0]  ;;  %v3762_v59 = vld [vmem:[#allocation11 + $0x18] sm:$0xf] }
 0x455   : > { %v3828_v52 = vld [vmem:[#allocation11 + $0xd8] sm:$0xf0] }
 0x456   : > { %v3831_v53 = vor.u32 %v4819_v51, %v3828_v52  ;;  %v4893_v51 = vld [vmem:[#allocation11 + $0x2e4] sm:$0xf0]  ;;  %v4885_v52 = vld [vmem:[#allocation11 + $0x2ac] sm:$0xf] }
 0x457   : > { %1884 = vmatpush.bf16.msrb.mxu3 %v3807_v6  ;;  %1919 = vmatpush.bf16.msra.mxu2 %v4075_v56  ;;  %v4018_v6 = vld [vmem:[#allocation11 + $0x218] sm:$0xf]  ;;  %v4802_v56 = vld [vmem:[#allocation11 + $0x14] sm:$0xf] }
 0x458   : > { %1945 = vmatpush.bf16.msrb.mxu1 %v4083_v61  ;;  %v4019_v11 = vor.u32 %v4875_v8, %v4018_v6  ;;  %1958 = vmatpush.bf16.msrb.mxu0 %v4087_v1  ;;  %v3759_v61 = vor.u32 %v4802_v56, %v3756_v58  ;;  %v3764_v1 = vld [vmem:[#allocation11 + $0x58] sm:$0xf0]  ;;  %v4026_v56 = vld [vmem:[#allocation11 + $0x220] sm:$0xf] }
 0x459   : > { %v3767_v0 = vor.u32 %v4803_v63, %v3764_v1  ;;  %v4877_v63 = vld [vmem:[#allocation11 + $0x264] sm:$0xf0]  ;;  %v4869_v1 = vld [vmem:[#allocation11 + $0x22c] sm:$0xf] }
 0x45b   : > { %1885 = vmatpush.bf16.msrb.mxu3 %v3743_v25  ;;  %1920 = vmatpush.bf16.msra.mxu2 %v4011_v4  ;;  %v4859_v25 = vld [vmem:[#allocation11 + $0x1d4] sm:$0xf0] }
 0x45c   : > { %1946 = vmatpush.bf16.msrb.mxu1 %v4019_v11  ;;  %v3955_v27 = vor.u32 %v4859_v25, %v3954_v24  ;;  %v4916_v24 = vld [vmem:[#allocation11 + $0x3a4] sm:$0xf] }
 0x45d   : > { %v4220_v25 = vld [vmem:[#allocation11 + $0x3e0] sm:$0xf0] }
 0x45f   : > { %1930 = vmatpush.bf16.msra.mxu3 %v4207_v35  ;;  %1921 = vmatpush.bf16.msra.mxu2 %v3947_v22  ;;  %v3884_v35 = vld [vmem:[#allocation11 + $0x150] sm:$0xf0]  ;;  %v4218_v22 = vld [vmem:[#allocation11 + $0x3a0] sm:$0xf] }
 0x460   : > { %1947 = vmatpush.bf16.msrb.mxu1 %v3955_v27  ;;  %v3887_v38 = vor.u32 %v4834_v33, %v3884_v35  ;;  %v4219_v32 = vor.u32 %v4924_v23, %v4218_v22  ;;  %v4223_v33 = vor.u32 %v4916_v24, %v4220_v25  ;;  %v4908_v35 = vld [vmem:[#allocation11 + $0x35c] sm:$0xf0] }
 0x461   : > { %v3898_v22 = vld [vmem:[#allocation11 + $0x120] sm:$0xf] }
 0x462   : > { %v4844_v23 = vld [vmem:[#allocation11 + $0x15c] sm:$0xf0] }
 0x463   : > { %1931 = vmatpush.bf16.msra.mxu3 %v4143_v47  ;;  %1922 = vmatpush.bf16.msra.mxu2 %v3883_v34  ;;  %v3826_v47 = vld [vmem:[#allocation11 + $0x98] sm:$0xf]  ;;  %v4154_v34 = vld [vmem:[#allocation11 + $0x320] sm:$0xf] }
 0x464   : > { %1948 = vmatpush.bf16.msrb.mxu1 %v3891_v39  ;;  %v3827_v50 = vor.u32 %v4827_v48, %v3826_v47  ;;  %v4162_v39 = vld [vmem:[#allocation11 + $0x328] sm:$0xf]  ;;  %v4155_v43 = vor.u32 %v4908_v35, %v4154_v34  ;;  %v4884_v48 = vld [vmem:[#allocation11 + $0x2a4] sm:$0xf]  ;;  %v3834_v35 = vld [vmem:[#allocation11 + $0xa0] sm:$0xf] }
 0x465   : > { %v4163_v46 = vor.u32 %v4909_v40, %v4162_v39  ;;  %v3836_v39 = vld [vmem:[#allocation11 + $0xe0] sm:$0xf0]  ;;  %v3842_v40 = vld [vmem:[#allocation11 + $0xa8] sm:$0xf] }
 0x467   : > { %1932 = vmatpush.bf16.msra.mxu3 %v4079_v60  ;;  %1923 = vmatpush.bf16.msra.mxu2 %v3819_v45  ;;  %v4811_v60 = vld [vmem:[#allocation11 + $0x54] sm:$0xf0]  ;;  %v4892_v45 = vld [vmem:[#allocation11 + $0x2dc] sm:$0xf0] }
 0x468   : > { %1949 = vmatpush.bf16.msrb.mxu1 %v3827_v50  ;;  %v3763_v62 = vor.u32 %v4811_v60, %v3762_v59  ;;  %v4098_v50 = vld [vmem:[#allocation11 + $0x2a8] sm:$0xf]  ;;  %v4091_v54 = vor.u32 %v4892_v45, %v4090_v19  ;;  %v4868_v60 = vld [vmem:[#allocation11 + $0x224] sm:$0xf] }
 0x469   : > { %v4099_v58 = vor.u32 %v4893_v51, %v4098_v50  ;;  %v3778_v51 = vld [vmem:[#allocation11 + $0x28] sm:$0xf] }
 0x46b   : > { %1924 = vmatpush.bf16.msra.mxu2 %v3755_v57  ;;  %v4876_v57 = vld [vmem:[#allocation11 + $0x25c] sm:$0xf0] }
 0x46c   : > { %1950 = vmatpush.bf16.msrb.mxu1 %v3763_v62  ;;  %v4034_v62 = vld [vmem:[#allocation11 + $0x228] sm:$0xf] }
 0x4b5   : > { %v1033_v9 = vpop.xlane.xlu2 %1032 }
 0x4b6   : > { %v1034_v12 = vmul.f32 %v1033_v9, %v5990_v14  ;;  %v4015_v9 = vor.u32 %v4866_v3, %v4012_v5 }
 0x4b8   : > { %v6091_v13 = vsub.f32 %v6086_v49, %v1034_v12  ;;  %v4867_v12 = vld [vmem:[#allocation11 + $0x21c] sm:$0xf]  ;;  %1933 = vmatpush.bf16.msra.mxu3 %v4015_v9 }
 0x4ba   : > { %v1036_v15 = vmul.f32 %v6091_v13, %v6091_v13 }
 0x4bc   : > { %1037 = vadd.xlane.f32.xlu2 %v1036_v15  ;;  %v4020_v15 = vld [vmem:[#allocation11 + $0x258] sm:$0xf0]  ;;  %1934 = vmatpush.bf16.msra.mxu3 %v3951_v26  ;;  %v4226_v26 = vld [vmem:[#allocation11 + $0x3a8] sm:$0xf] }
 0x4bd   : > { %v4023_v16 = vor.u32 %v4867_v12, %v4020_v15  ;;  %v5224_v15 = vld [vmem:[%s6290_s9] ss:$0 sm:$0xff]  ;;  %v4227_v36 = vor.u32 %v4925_v28, %v4226_v26  ;;  %v4836_v26 = vld [vmem:[#allocation11 + $0x124] sm:$0xf]  ;;  %v3906_v28 = vld [vmem:[#allocation11 + $0x128] sm:$0xf] }
 0x4bf   : > { %1959 = vmatpush.bf16.msrb.mxu0 %v4023_v16 }
 0x4c0   : > { %1935 = vmatpush.bf16.msra.mxu3 %v3887_v38  ;;  %v4900_v38 = vld [vmem:[#allocation11 + $0x324] sm:$0xf] }
 0x4c3   : > { %1960 = vmatpush.bf16.msrb.mxu0 %v3959_v30  ;;  %v4228_v30 = vld [vmem:[#allocation11 + $0x3e8] sm:$0xf0] }
 0x4c4   : > { %1936 = vmatpush.bf16.msra.mxu3 %v3823_v18  ;;  %v4231_v37 = vor.u32 %v4917_v29, %v4228_v30  ;;  %v4092_v18 = vld [vmem:[#allocation11 + $0x2e0] sm:$0xf0]  ;;  %v4845_v29 = vld [vmem:[#allocation11 + $0x164] sm:$0xf0]  ;;  %v4837_v30 = vld [vmem:[#allocation11 + $0x12c] sm:$0xf] }
 0x4c5   : > { %v4095_v55 = vor.u32 %v4884_v48, %v4092_v18  ;;  %v3772_v48 = vld [vmem:[#allocation11 + $0x60] sm:$0xf0] }
 0x4c7   : > { %1961 = vmatpush.bf16.msrb.mxu0 %v3895_v42  ;;  %v4164_v42 = vld [vmem:[#allocation11 + $0x368] sm:$0xf0] }
 0x4c8   : > { %1937 = vmatpush.bf16.msra.mxu3 %v3759_v61  ;;  %v4167_v47 = vor.u32 %v4901_v41, %v4164_v42  ;;  %v4028_v61 = vld [vmem:[#allocation11 + $0x260] sm:$0xf0]  ;;  %v4829_v41 = vld [vmem:[#allocation11 + $0xe4] sm:$0xf0]  ;;  %v4821_v42 = vld [vmem:[#allocation11 + $0xac] sm:$0xf] }
 0x4c9   : > { %v3843_v18 = vor.u32 %v4829_v41, %v3842_v40  ;;  %v4044_v40 = vld [vmem:[#allocation11 + $0x270] sm:$0xf0]  ;;  %v4050_v41 = vld [vmem:[#allocation11 + $0x238] sm:$0xf] }
 0x4cb   : > { %1962 = vmatpush.bf16.msrb.mxu0 %v3831_v53  ;;  %v4100_v53 = vld [vmem:[#allocation11 + $0x2e8] sm:$0xf0] }
 0x4cc   : > { %v4103_v59 = vor.u32 %v4885_v52, %v4100_v53  ;;  %v4813_v52 = vld [vmem:[#allocation11 + $0x64] sm:$0xf0]  ;;  %v4805_v53 = vld [vmem:[#allocation11 + $0x2c] sm:$0xf] }
 0x4cf   : > { %1963 = vmatpush.bf16.msrb.mxu0 %v3767_v0  ;;  %v4036_v0 = vld [vmem:[#allocation11 + $0x268] sm:$0xf0] }
 0x52f   : > { %v1038_v2 = vpop.xlane.xlu2 %1037 }
 0x530   : > { %v1039_v3 = vmul.f32 %v1038_v2, %v5990_v14  ;;  %v4027_v2 = vor.u32 %v4876_v57, %v4026_v56  ;;  %v4926_v56 = vld [vmem:[#allocation11 + $0x3ec] sm:$0xf0]  ;;  %v4918_v57 = vld [vmem:[#allocation11 + $0x3b4] sm:$0xf] }
 0x532   : > { %v1040_v4 = vadd.f32 1e-06, %v1039_v3  ;;  %v4031_v3 = vor.u32 %v4868_v60, %v4028_v61 }
 0x534   : > { %5241 = vrsqrt.f32 %v1040_v4  ;;  %vm1047_vm11 = vweird.f32 %v1040_v4 }
 0x53a   : > { %v5242_v5 = vpop.eup %5241 }
 0x53b   : > { %v1042_v6 = vmul.f32 %v5242_v5, %v1040_v4  ;;  %vm1048_vm10 = vweird.f32 %v5242_v5  ;;  %v3962_v4 = vld [vmem:[#allocation11 + $0x1a0] sm:$0xf] }
 0x53c   : > { %vm1049_vm12 = vmor %vm1047_vm11, %vm1048_vm10 }
 0x53d   : > { %v1043_v8 = vmul.f32 %v5242_v5, %v1042_v6  ;;  %v4035_v6 = vor.u32 %v4877_v63, %v4034_v62  ;;  %v4927_v62 = vld [vmem:[#allocation11 + $0x3f4] sm:$0xf0]  ;;  %v4919_v63 = vld [vmem:[#allocation11 + $0x3bc] sm:$0xf] }
 0x53f   : > { %v1044_v9 = vmul.f32 0.5, %v1043_v8  ;;  %v4039_v8 = vor.u32 %v4869_v1, %v4036_v0  ;;  %v4244_v1 = vld [vmem:[#allocation11 + $0x3f8] sm:$0xf0]  ;;  %v3779_v0 = vor.u32 %v4813_v52, %v3778_v51  ;;  %v3980_v51 = vld [vmem:[#allocation11 + $0x1f0] sm:$0xf0] }
 0x540   : > { %v3986_v52 = vld [vmem:[#allocation11 + $0x1b8] sm:$0xf] }
 0x541   : > { %v1045_v11 = vsub.f32 1.5, %v1044_v9  ;;  %v4852_v9 = vld [vmem:[#allocation11 + $0x1a4] sm:$0xf] }
 0x543   : > { %v1046_v12 = vmul.f32 %v5242_v5, %v1045_v11  ;;  %v3964_v11 = vld [vmem:[#allocation11 + $0x1e0] sm:$0xf0] }
 0x545   : > { %v1050_v16 = vsel %vm1049_vm12, %v5242_v5, %v1046_v12  ;;  %v4860_v5 = vld [vmem:[#allocation11 + $0x1dc] sm:$0xf0]  ;;  %v3970_v12 = vld [vmem:[#allocation11 + $0x1a8] sm:$0xf] }
 0x546   : > { %v1051_v20 = vmul.f32 %v1050_v16, %v6091_v13  ;;  %v4156_v13 = vld [vmem:[#allocation11 + $0x360] sm:$0xf0]  ;;  %v4853_v16 = vld [vmem:[#allocation11 + $0x1ac] sm:$0xf] }
 0x547   : > { %v4159_v44 = vor.u32 %v4900_v38, %v4156_v13  ;;  %v4820_v13 = vld [vmem:[#allocation11 + $0xa4] sm:$0xf] }
 0x548   : > { %v1055_v21 = vmul.f32 %v5224_v15, %v1051_v20  ;;  %v4861_v15 = vld [vmem:[#allocation11 + $0x1e4] sm:$0xf0]  ;;  %v3963_v20 = vor.u32 %v4860_v5, %v3962_v4  ;;  %v3839_v45 = vor.u32 %v4820_v13, %v3836_v39  ;;  %v4170_v5 = vld [vmem:[#allocation11 + $0x330] sm:$0xf]  ;;  %v4870_v39 = vld [vmem:[#allocation11 + $0x234] sm:$0xf] }
 0x549   : > { %v3971_v24 = vor.u32 %v4861_v15, %v3970_v12  ;;  %v4172_v12 = vld [vmem:[#allocation11 + $0x370] sm:$0xf0]  ;;  %v4178_v15 = vld [vmem:[#allocation11 + $0x338] sm:$0xf] }
 0x54a   : > { %v1059_v27 = vadd.f32 %v5225_v17, %v1055_v21  ;;  %v3972_v17 = vld [vmem:[#allocation11 + $0x1e8] sm:$0xf0]  ;;  %v3967_v21 = vor.u32 %v4852_v9, %v3964_v11  ;;  %v4247_v9 = vor.u32 %v4919_v63, %v4244_v1  ;;  %v4902_v11 = vld [vmem:[#allocation11 + $0x334] sm:$0xf]  ;;  %v3922_v1 = vld [vmem:[#allocation11 + $0x138] sm:$0xf] }
 0x54b   : > { %v3975_v25 = vor.u32 %v4853_v16, %v3972_v17  ;;  %v4911_v16 = vld [vmem:[#allocation11 + $0x374] sm:$0xf0]  ;;  %v4903_v17 = vld [vmem:[#allocation11 + $0x33c] sm:$0xf]  ;;  %v3916_v63 = vld [vmem:[#allocation11 + $0x170] sm:$0xf0] }
 0x54c   : > { %v6103_v31 = vpack.c.bf16 %v1059_v27, %v1059_v27  ;;  %v3900_v27 = vld [vmem:[#allocation11 + $0x160] sm:$0xf0] }
 0x54d   : > { %v3903_v34 = vor.u32 %v4836_v26, %v3900_v27  ;;  %v4886_v27 = vld [vmem:[#allocation11 + $0x2b4] sm:$0xf] }
 0x54e   : > { %1873 = vmatmul.bf16.vlgmr.msrb.gmra.mxu2 %v6103_v31  ;;  %1886 = vmatmul.bf16.vlgmr.msrb.gmra.mxu3 %v6103_v31 }
 0x54f   : > { %1899 = vmatmul.bf16.vlgmr.msra.gmra.mxu1 %v6103_v31  ;;  %1912 = vmatmul.bf16.vlgmr.msra.gmra.mxu0 %v6103_v31 }
 0x550   : > { %1969 = vmatpush.bf16.msrb.mxu2 %v4219_v32  ;;  %1982 = vmatpush.bf16.msrb.mxu3 %v4223_v33  ;;  %v3908_v32 = vld [vmem:[#allocation11 + $0x168] sm:$0xf0]  ;;  %v3899_v33 = vor.u32 %v4844_v23, %v3898_v22  ;;  %v4175_v22 = vor.u32 %v4902_v11, %v4172_v12  ;;  %v4106_v23 = vld [vmem:[#allocation11 + $0x2b0] sm:$0xf]  ;;  %v4822_v12 = vld [vmem:[#allocation11 + $0xb4] sm:$0xf] }
 0x551   : > { %1995 = vmatpush.bf16.msra.mxu1 %v4227_v36  ;;  %2008 = vmatpush.bf16.msra.mxu0 %v4231_v37  ;;  %v4828_v36 = vld [vmem:[#allocation11 + $0xdc] sm:$0xf0]  ;;  %v3907_v37 = vor.u32 %v4845_v29, %v3906_v28  ;;  %v3911_v38 = vor.u32 %v4837_v30, %v3908_v32  ;;  %v4108_v28 = vld [vmem:[#allocation11 + $0x2f0] sm:$0xf0]  ;;  %v4114_v29 = vld [vmem:[#allocation11 + $0x2b8] sm:$0xf] }
 0x552   : > { %v3835_v19 = vor.u32 %v4828_v36, %v3834_v35  ;;  %v4895_v30 = vld [vmem:[#allocation11 + $0x2f4] sm:$0xf0]  ;;  %v4887_v32 = vld [vmem:[#allocation11 + $0x2bc] sm:$0xf]  ;;  %v4111_v35 = vor.u32 %v4886_v27, %v4108_v28  ;;  %v4042_v36 = vld [vmem:[#allocation11 + $0x230] sm:$0xf] }
 0x553   : > { %v4806_v28 = vld [vmem:[#allocation11 + $0x34] sm:$0xf] }
 0x554   : > { %1970 = vmatpush.bf16.msrb.mxu2 %v4155_v43  ;;  %1983 = vmatpush.bf16.msrb.mxu3 %v4159_v44  ;;  %v3844_v43 = vld [vmem:[#allocation11 + $0xe8] sm:$0xf0]  ;;  %v3770_v44 = vld [vmem:[#allocation11 + $0x20] sm:$0xf] }
 0x555   : > { %1996 = vmatpush.bf16.msra.mxu1 %v4163_v46  ;;  %2009 = vmatpush.bf16.msra.mxu0 %v4167_v47  ;;  %v4812_v46 = vld [vmem:[#allocation11 + $0x5c] sm:$0xf0]  ;;  %v4804_v47 = vld [vmem:[#allocation11 + $0x24] sm:$0xf]  ;;  %v3847_v50 = vor.u32 %v4821_v42, %v3844_v43  ;;  %v4879_v42 = vld [vmem:[#allocation11 + $0x274] sm:$0xf0] }
 0x556   : > { %v3771_v60 = vor.u32 %v4812_v46, %v3770_v44  ;;  %v3775_v61 = vor.u32 %v4804_v47, %v3772_v48  ;;  %v4871_v43 = vld [vmem:[#allocation11 + $0x23c] sm:$0xf]  ;;  %v3978_v46 = vld [vmem:[#allocation11 + $0x1b0] sm:$0xf]  ;;  %v4051_v48 = vor.u32 %v4879_v42, %v4050_v41  ;;  %v4943_v41 = vld [vmem:[#allocation14 + $0x78] sm:$0xff] }
 0x557   : > { %v4052_v44 = vld [vmem:[#allocation11 + $0x278] sm:$0xf0]  ;;  %v4862_v47 = vld [vmem:[#allocation11 + $0x1ec] sm:$0xf0]  ;;  %v4950_v42 = vld [vmem:[#allocation14 + $0xb0] sm:$0xff] }
 0x558   : > { %1971 = vmatpush.bf16.msrb.mxu2 %v4091_v54  ;;  %1984 = vmatpush.bf16.msrb.mxu3 %v4095_v55  ;;  %v3780_v54 = vld [vmem:[#allocation11 + $0x68] sm:$0xf0]  ;;  %v4234_v55 = vld [vmem:[#allocation11 + $0x3b0] sm:$0xf] }
 0x559   : > { %1997 = vmatpush.bf16.msra.mxu1 %v4099_v58  ;;  %2010 = vmatpush.bf16.msra.mxu0 %v4103_v59  ;;  %v4236_v58 = vld [vmem:[#allocation11 + $0x3f0] sm:$0xf0]  ;;  %v4242_v59 = vld [vmem:[#allocation11 + $0x3b8] sm:$0xf] }
 0x55a   : > { %v4239_v4 = vor.u32 %v4918_v57, %v4236_v58  ;;  %v3914_v58 = vld [vmem:[#allocation11 + $0x130] sm:$0xf] }
 0x55c   : > { %1972 = vmatpush.bf16.msrb.mxu2 %v4027_v2  ;;  %1985 = vmatpush.bf16.msrb.mxu3 %v4031_v3  ;;  %v3783_v2 = vor.u32 %v4805_v53, %v3780_v54  ;;  %v4235_v3 = vor.u32 %v4926_v56, %v4234_v55  ;;  %v4863_v53 = vld [vmem:[#allocation11 + $0x1f4] sm:$0xf0]  ;;  %v4855_v54 = vld [vmem:[#allocation11 + $0x1bc] sm:$0xf]  ;;  %v3979_v56 = vor.u32 %v4862_v47, %v3978_v46 }
 0x55d   : > { %1998 = vmatpush.bf16.msra.mxu1 %v4035_v6  ;;  %2011 = vmatpush.bf16.msra.mxu0 %v4039_v8  ;;  %v4910_v6 = vld [vmem:[#allocation11 + $0x36c] sm:$0xf0]  ;;  %v4243_v8 = vor.u32 %v4927_v62, %v4242_v59  ;;  %v3988_v55 = vld [vmem:[#allocation11 + $0x1f8] sm:$0xf0]  ;;  %v4838_v62 = vld [vmem:[#allocation11 + $0x134] sm:$0xf] }
 0x55e   : > { %1925 = vmatmul.bf16.vlgmr.msra.gmra.mxu2 %v6103_v31  ;;  %1938 = vmatmul.bf16.vlgmr.msra.gmra.mxu3 %v6103_v31  ;;  %v4846_v59 = vld [vmem:[#allocation11 + $0x16c] sm:$0xf0]  ;;  %v4957_v46 = vld [vmem:[#allocation14 + $0xe8] sm:$0xff] }
 0x55f   : > { %1951 = vmatmul.bf16.vlgmr.msrb.gmra.mxu1 %v6103_v31  ;;  %1964 = vmatmul.bf16.vlgmr.msrb.gmra.mxu0 %v6103_v31  ;;  %v4933_v47 = vld [vmem:[#allocation14 + $0x28] sm:$0xff] }
 0x560   : > { %1973 = vmatpush.bf16.msrb.mxu2 %v3963_v20  ;;  %1986 = vmatpush.bf16.msrb.mxu3 %v3967_v21  ;;  %v4180_v20 = vld [vmem:[#allocation11 + $0x378] sm:$0xf0]  ;;  %v4171_v21 = vor.u32 %v4910_v6, %v4170_v5  ;;  %v3919_v5 = vor.u32 %v4838_v62, %v3916_v63  ;;  %v3850_v6 = vld [vmem:[#allocation11 + $0xb0] sm:$0xf] }
 0x561   : > { %1999 = vmatpush.bf16.msra.mxu1 %v3971_v24  ;;  %2012 = vmatpush.bf16.msra.mxu0 %v3975_v25  ;;  %v4894_v24 = vld [vmem:[#allocation11 + $0x2ec] sm:$0xf0]  ;;  %v4179_v25 = vor.u32 %v4911_v16, %v4178_v15  ;;  %v4183_v26 = vor.u32 %v4903_v17, %v4180_v20  ;;  %v3852_v15 = vld [vmem:[#allocation11 + $0xf0] sm:$0xf0]  ;;  %v3858_v16 = vld [vmem:[#allocation11 + $0xb8] sm:$0xf] }
 0x562   : > { %v4831_v17 = vld [vmem:[#allocation11 + $0xf4] sm:$0xf0]  ;;  %v4823_v20 = vld [vmem:[#allocation11 + $0xbc] sm:$0xf] }
 0x563   : > { %v4929_v62 = vld [vmem:[#allocation14 + $0x8] sm:$0xff] }
 0x564   : > { %1974 = vmatpush.bf16.msrb.mxu2 %v3899_v33  ;;  %1987 = vmatpush.bf16.msrb.mxu3 %v3903_v34  ;;  %v4116_v33 = vld [vmem:[#allocation11 + $0x2f8] sm:$0xf0]  ;;  %v4107_v34 = vor.u32 %v4894_v24, %v4106_v23  ;;  %v3855_v23 = vor.u32 %v4822_v12, %v3852_v15  ;;  %v3786_v24 = vld [vmem:[#allocation11 + $0x30] sm:$0xf]  ;;  %v4966_v12 = vld [vmem:[#allocation14 + $0x130] sm:$0xff] }
 0x565   : > { %2000 = vmatpush.bf16.msra.mxu1 %v3907_v37  ;;  %2013 = vmatpush.bf16.msra.mxu0 %v3911_v38  ;;  %v4878_v37 = vld [vmem:[#allocation11 + $0x26c] sm:$0xf0]  ;;  %v4115_v38 = vor.u32 %v4895_v30, %v4114_v29  ;;  %v4119_v13 = vor.u32 %v4887_v32, %v4116_v33  ;;  %v3788_v29 = vld [vmem:[#allocation11 + $0x70] sm:$0xf0]  ;;  %v3794_v30 = vld [vmem:[#allocation11 + $0x38] sm:$0xf] }
 0x566   : > { %v4815_v32 = vld [vmem:[#allocation11 + $0x74] sm:$0xf0]  ;;  %v4807_v33 = vld [vmem:[#allocation11 + $0x3c] sm:$0xf]  ;;  %v4974_v15 = vld [vmem:[#allocation14 + $0x170] sm:$0xff] }
 0x567   : > { %v4937_v63 = vld [vmem:[#allocation14 + $0x48] sm:$0xff] }
 0x568   : > { %1975 = vmatpush.bf16.msrb.mxu2 %v3835_v19  ;;  %1988 = vmatpush.bf16.msrb.mxu3 %v3839_v45  ;;  %v4043_v19 = vor.u32 %v4878_v37, %v4042_v36  ;;  %v4047_v45 = vor.u32 %v4870_v39, %v4044_v40  ;;  %v3791_v36 = vor.u32 %v4806_v28, %v3788_v29  ;;  %v4959_v39 = vld [vmem:[#allocation14 + $0xf8] sm:$0xff] }
 0x569   : > { %2001 = vmatpush.bf16.msra.mxu1 %v3843_v18  ;;  %2014 = vmatpush.bf16.msra.mxu0 %v3847_v50  ;;  %v4055_v18 = vor.u32 %v4871_v43, %v4052_v44  ;;  %v4854_v50 = vld [vmem:[#allocation11 + $0x1b4] sm:$0xf]  ;;  %v3795_v37 = vor.u32 %v4815_v32, %v3794_v30  ;;  %v4935_v40 = vld [vmem:[#allocation14 + $0x38] sm:$0xff]  ;;  %v4958_v43 = vld [vmem:[#allocation14 + $0xf0] sm:$0xff] }
 0x56a   : > { %v3983_v57 = vor.u32 %v4854_v50, %v3980_v51  ;;  %v4934_v44 = vld [vmem:[#allocation14 + $0x30] sm:$0xff]  ;;  %v4956_v50 = vld [vmem:[#allocation14 + $0xe0] sm:$0xff]  ;;  %v4963_v28 = vld [vmem:[#allocation14 + $0x118] sm:$0xff] }
 0x56b   : > { %v4932_v51 = vld [vmem:[#allocation14 + $0x20] sm:$0xff]  ;;  %v4971_v29 = vld [vmem:[#allocation14 + $0x158] sm:$0xff]  ;;  %v4978_v30 = vld [vmem:[#allocation14 + $0x190] sm:$0xff] }
 0x56c   : > { %1976 = vmatpush.bf16.msrb.mxu2 %v3771_v60  ;;  %1989 = vmatpush.bf16.msrb.mxu3 %v3775_v61  ;;  %v3987_v60 = vor.u32 %v4863_v53, %v3986_v52  ;;  %v3991_v61 = vor.u32 %v4855_v54, %v3988_v55  ;;  %v4947_v52 = vld [vmem:[#allocation14 + $0x98] sm:$0xff]  ;;  %v4986_v32 = vld [vmem:[#allocation14 + $0x1d0] sm:$0xff] }
 0x56d   : > { %2002 = vmatpush.bf16.msra.mxu1 %v3779_v0  ;;  %2015 = vmatpush.bf16.msra.mxu0 %v3783_v2  ;;  %v4847_v0 = vld [vmem:[#allocation11 + $0x174] sm:$0xf0]  ;;  %v4839_v2 = vld [vmem:[#allocation11 + $0x13c] sm:$0xf]  ;;  %v4955_v53 = vld [vmem:[#allocation14 + $0xd8] sm:$0xff] }
 0x56e   : > { %v4931_v54 = vld [vmem:[#allocation14 + $0x18] sm:$0xff] }
 0x56f   : > { %1977 = vmatmul.bf16.vlgmr.msrb.gmra.mxu2 %v6103_v31  ;;  %1990 = vmatmul.bf16.vlgmr.msrb.gmra.mxu3 %v6103_v31  ;;  %v4939_v55 = vld [vmem:[#allocation14 + $0x58] sm:$0xff] }
 0x570   : > { %2021 = vmatpush.bf16.msra.mxu2 %v4235_v3  ;;  %2034 = vmatpush.bf16.msra.mxu3 %v4239_v4  ;;  %v3924_v3 = vld [vmem:[#allocation11 + $0x178] sm:$0xf0]  ;;  %v3915_v4 = vor.u32 %v4846_v59, %v3914_v58  ;;  %v4930_v58 = vld [vmem:[#allocation14 + $0x10] sm:$0xff] }
 0x571   : > { %2047 = vmatpush.bf16.msrb.mxu1 %v4243_v8  ;;  %2060 = vmatpush.bf16.msrb.mxu0 %v4247_v9  ;;  %v4830_v8 = vld [vmem:[#allocation11 + $0xec] sm:$0xf0]  ;;  %v3923_v9 = vor.u32 %v4847_v0, %v3922_v1  ;;  %v3927_v11 = vor.u32 %v4839_v2, %v3924_v3  ;;  %v4938_v59 = vld [vmem:[#allocation14 + $0x50] sm:$0xff]  ;;  %v4983_v2 = vld [vmem:[#allocation14 + $0x1b8] sm:$0xff] }
 0x572   : > { %2003 = vmatmul.bf16.vlgmr.msra.gmra.mxu1 %v6103_v31  ;;  %2016 = vmatmul.bf16.vlgmr.msra.gmra.mxu0 %v6103_v31  ;;  %v4944_v1 = vld [vmem:[#allocation14 + $0x80] sm:$0xff]  ;;  %v4991_v3 = vld [vmem:[#allocation14 + $0x1f8] sm:$0xff] }
 0x573   : > { %v4952_v0 = vld [vmem:[#allocation14 + $0xc0] sm:$0xff] }
 0x574   : > { %2022 = vmatpush.bf16.msra.mxu2 %v4171_v21  ;;  %2035 = vmatpush.bf16.msra.mxu3 %v4175_v22  ;;  %v3860_v21 = vld [vmem:[#allocation11 + $0xf8] sm:$0xf0]  ;;  %v3851_v22 = vor.u32 %v4830_v8, %v3850_v6  ;;  %v4967_v6 = vld [vmem:[#allocation14 + $0x138] sm:$0xff] }
 0x575   : > { %2048 = vmatpush.bf16.msrb.mxu1 %v4179_v25  ;;  %2061 = vmatpush.bf16.msrb.mxu0 %v4183_v26  ;;  %v4814_v25 = vld [vmem:[#allocation11 + $0x6c] sm:$0xf0]  ;;  %v3859_v26 = vor.u32 %v4831_v17, %v3858_v16  ;;  %v3863_v27 = vor.u32 %v4823_v20, %v3860_v21  ;;  %v4975_v8 = vld [vmem:[#allocation14 + $0x178] sm:$0xff]  ;;  %v4981_v16 = vld [vmem:[#allocation14 + $0x1a8] sm:$0xff] }
 0x576   : > { %v4989_v17 = vld [vmem:[#allocation14 + $0x1e8] sm:$0xff] }
 0x577   : > { %v4965_v20 = vld [vmem:[#allocation14 + $0x128] sm:$0xff] }
 0x578   : > { %2023 = vmatpush.bf16.msra.mxu2 %v4107_v34  ;;  %2036 = vmatpush.bf16.msra.mxu3 %v4111_v35  ;;  %v3796_v34 = vld [vmem:[#allocation11 + $0x78] sm:$0xf0]  ;;  %v3787_v35 = vor.u32 %v4814_v25, %v3786_v24  ;;  %v4964_v24 = vld [vmem:[#allocation14 + $0x120] sm:$0xff] }
 0x579   : > { %2049 = vmatpush.bf16.msrb.mxu1 %v4115_v38  ;;  %2062 = vmatpush.bf16.msrb.mxu0 %v4119_v13  ;;  %v3799_v38 = vor.u32 %v4807_v33, %v3796_v34  ;;  %v4951_v13 = vld [vmem:[#allocation14 + $0xb8] sm:$0xff]  ;;  %v4973_v21 = vld [vmem:[#allocation14 + $0x168] sm:$0xff]  ;;  %v4972_v25 = vld [vmem:[#allocation14 + $0x160] sm:$0xff] }
 0x57a   : > { %v4962_v33 = vld [vmem:[#allocation14 + $0x110] sm:$0xff] }
 0x57b   : > { %v4970_v34 = vld [vmem:[#allocation14 + $0x150] sm:$0xff] }
 0x57c   : > { %2024 = vmatpush.bf16.msra.mxu2 %v4043_v19  ;;  %2037 = vmatpush.bf16.msra.mxu3 %v4047_v45  ;;  %v4942_v19 = vld [vmem:[#allocation14 + $0x70] sm:$0xff]  ;;  %v4949_v45 = vld [vmem:[#allocation14 + $0xa8] sm:$0xff] }
 0x57d   : > { %2050 = vmatpush.bf16.msrb.mxu1 %v4051_v48  ;;  %2063 = vmatpush.bf16.msrb.mxu0 %v4055_v18  ;;  %v4941_v48 = vld [vmem:[#allocation14 + $0x68] sm:$0xff]  ;;  %v4948_v18 = vld [vmem:[#allocation14 + $0xa0] sm:$0xff] }
 0x580   : > { %2025 = vmatpush.bf16.msra.mxu2 %v3979_v56  ;;  %2038 = vmatpush.bf16.msra.mxu3 %v3983_v57  ;;  %v4946_v56 = vld [vmem:[#allocation14 + $0x90] sm:$0xff] }
 0x581   : > { %2051 = vmatpush.bf16.msrb.mxu1 %v3987_v60  ;;  %2064 = vmatpush.bf16.msrb.mxu0 %v3991_v61  ;;  %v4954_v57 = vld [vmem:[#allocation14 + $0xd0] sm:$0xff]  ;;  %v4945_v60 = vld [vmem:[#allocation14 + $0x88] sm:$0xff] }
 0x582   : > { %v4953_v61 = vld [vmem:[#allocation14 + $0xc8] sm:$0xff] }
 0x584   : > { %2026 = vmatpush.bf16.msra.mxu2 %v3915_v4  ;;  %2039 = vmatpush.bf16.msra.mxu3 %v3919_v5  ;;  %v4928_v4 = vld [vmem:[#allocation14] sm:$0xff] }
 0x585   : > { %2052 = vmatpush.bf16.msrb.mxu1 %v3923_v9  ;;  %2065 = vmatpush.bf16.msrb.mxu0 %v3927_v11  ;;  %v4936_v5 = vld [vmem:[#allocation14 + $0x40] sm:$0xff]  ;;  %v4982_v9 = vld [vmem:[#allocation14 + $0x1b0] sm:$0xff] }
 0x586   : > { %v4990_v11 = vld [vmem:[#allocation14 + $0x1f0] sm:$0xff] }
 0x588   : > { %2027 = vmatpush.bf16.msra.mxu2 %v3851_v22  ;;  %2040 = vmatpush.bf16.msra.mxu3 %v3855_v23  ;;  %v4980_v22 = vld [vmem:[#allocation14 + $0x1a0] sm:$0xff] }
 0x589   : > { %2053 = vmatpush.bf16.msrb.mxu1 %v3859_v26  ;;  %2066 = vmatpush.bf16.msrb.mxu0 %v3863_v27  ;;  %v4988_v23 = vld [vmem:[#allocation14 + $0x1e0] sm:$0xff]  ;;  %v4979_v26 = vld [vmem:[#allocation14 + $0x198] sm:$0xff] }
 0x58a   : > { %v4987_v27 = vld [vmem:[#allocation14 + $0x1d8] sm:$0xff] }
 0x58c   : > { %2028 = vmatpush.bf16.msra.mxu2 %v3787_v35  ;;  %2041 = vmatpush.bf16.msra.mxu3 %v3791_v36  ;;  %v4977_v35 = vld [vmem:[#allocation14 + $0x188] sm:$0xff] }
 0x58d   : > { %2054 = vmatpush.bf16.msrb.mxu1 %v3795_v37  ;;  %2067 = vmatpush.bf16.msrb.mxu0 %v3799_v38  ;;  %v4985_v36 = vld [vmem:[#allocation14 + $0x1c8] sm:$0xff] }
 0x58e   : > { %v4961_v37 = vld [vmem:[#allocation14 + $0x108] sm:$0xff] }
 0x58f   : > { %2029 = vmatmul.bf16.vlgmr.msra.gmra.mxu2 %v6103_v31  ;;  %2042 = vmatmul.bf16.vlgmr.msra.gmra.mxu3 %v6103_v31  ;;  %v4969_v38 = vld [vmem:[#allocation14 + $0x148] sm:$0xff] }
 0x590   : > { %2055 = vmatmul.bf16.vlgmr.msrb.gmra.mxu1 %v6103_v31  ;;  %2068 = vmatmul.bf16.vlgmr.msrb.gmra.mxu0 %v6103_v31  ;;  %v4940_v31 = vld [vmem:[#allocation14 + $0x60] sm:$0xff] }
 0x591   : > { %3159 = vmatpush.bf16.msra.mxu1 %v4951_v13  ;;  %3172 = vmatpush.bf16.msra.mxu0 %v4959_v39  ;;  %v4976_v13 = vld [vmem:[#allocation14 + $0x180] sm:$0xff] }
 0x592   : > { %3133 = vmatpush.bf16.msrb.mxu2 %v4935_v40  ;;  %3146 = vmatpush.bf16.msrb.mxu3 %v4943_v41  ;;  %v4984_v39 = vld [vmem:[#allocation14 + $0x1c0] sm:$0xff] }
 0x593   : > { %v4960_v40 = vld [vmem:[#allocation14 + $0x100] sm:$0xff] }
 0x594   : > { %v4968_v41 = vld [vmem:[#allocation14 + $0x140] sm:$0xff] }
 0x595   : > { %3160 = vmatpush.bf16.msra.mxu1 %v4950_v42  ;;  %3173 = vmatpush.bf16.msra.mxu0 %v4958_v43  ;;  %v6121_v42 = vld [vmem:[#allocation13] sm:$0xff] }
 0x596   : > { %3134 = vmatpush.bf16.msrb.mxu2 %v4934_v44  ;;  %3147 = vmatpush.bf16.msrb.mxu3 %v4942_v19  ;;  %v1195_v43 = vperm.slane %v6121_v42, 2  ;;  %v1196_v44 = vperm.slane %v6121_v42, 3 }
 0x599   : > { %3161 = vmatpush.bf16.msra.mxu1 %v4949_v45  ;;  %3174 = vmatpush.bf16.msra.mxu0 %v4957_v46 }
 0x59a   : > { %3135 = vmatpush.bf16.msrb.mxu2 %v4933_v47  ;;  %3148 = vmatpush.bf16.msrb.mxu3 %v4941_v48  ;;  %v1193_v48 = vperm.slane %v6121_v42, 0 }
 0x59d   : > { %3162 = vmatpush.bf16.msra.mxu1 %v4948_v18  ;;  %3175 = vmatpush.bf16.msra.mxu0 %v4956_v50  ;;  %v1194_v18 = vperm.slane %v6121_v42, 1 }
 0x59e   : > { %3136 = vmatpush.bf16.msrb.mxu2 %v4932_v51  ;;  %3149 = vmatpush.bf16.msrb.mxu3 %v4940_v31  ;;  %v5015_v31 = vld [vmem:[#allocation14 + $0x2b8] sm:$0xff] }
 0x5a1   : > { %3163 = vmatpush.bf16.msra.mxu1 %v4947_v52  ;;  %3176 = vmatpush.bf16.msra.mxu0 %v4955_v53  ;;  %v5023_v52 = vld [vmem:[#allocation14 + $0x2f8] sm:$0xff] }
 0x5a2   : > { %3137 = vmatpush.bf16.msrb.mxu2 %v4931_v54  ;;  %3150 = vmatpush.bf16.msrb.mxu3 %v4939_v55 }
 0x5a5   : > { %3164 = vmatpush.bf16.msra.mxu1 %v4946_v56  ;;  %3177 = vmatpush.bf16.msra.mxu0 %v4954_v57 }
 0x5a6   : > { %3138 = vmatpush.bf16.msrb.mxu2 %v4930_v58  ;;  %3151 = vmatpush.bf16.msrb.mxu3 %v4938_v59 }
 0x5a9   : > { %3165 = vmatpush.bf16.msra.mxu1 %v4945_v60  ;;  %3178 = vmatpush.bf16.msra.mxu0 %v4953_v61 }
 0x5aa   : > { %3139 = vmatpush.bf16.msrb.mxu2 %v4929_v62  ;;  %3152 = vmatpush.bf16.msrb.mxu3 %v4937_v63  ;;  %v5014_v63 = vld [vmem:[#allocation14 + $0x2b0] sm:$0xff] }
 0x5ad   : > { %3166 = vmatpush.bf16.msra.mxu1 %v4944_v1  ;;  %3179 = vmatpush.bf16.msra.mxu0 %v4952_v0  ;;  %v5022_v1 = vld [vmem:[#allocation14 + $0x2f0] sm:$0xff] }
 0x5ae   : > { %3140 = vmatpush.bf16.msrb.mxu2 %v4928_v4  ;;  %3153 = vmatpush.bf16.msrb.mxu3 %v4936_v5  ;;  %v5007_v4 = vld [vmem:[#allocation14 + $0x278] sm:$0xff]  ;;  %v5013_v5 = vld [vmem:[#allocation14 + $0x2a8] sm:$0xff] }
 0x5b1   : > { %3211 = vmatpush.bf16.msrb.mxu1 %v4983_v2  ;;  %3224 = vmatpush.bf16.msrb.mxu0 %v4991_v3  ;;  %v4999_v3 = vld [vmem:[#allocation14 + $0x238] sm:$0xff] }
 0x5b2   : > { %3185 = vmatpush.bf16.msra.mxu2 %v4967_v6  ;;  %3198 = vmatpush.bf16.msra.mxu3 %v4975_v8  ;;  %v5021_v6 = vld [vmem:[#allocation14 + $0x2e8] sm:$0xff] }
 0x5b5   : > { %3212 = vmatpush.bf16.msrb.mxu1 %v4982_v9  ;;  %3225 = vmatpush.bf16.msrb.mxu0 %v4990_v11  ;;  %v1199_v11 = vperm.slane %v6121_v42, 6 }
 0x5b6   : > { %3186 = vmatpush.bf16.msra.mxu2 %v4966_v12  ;;  %3199 = vmatpush.bf16.msra.mxu3 %v4974_v15  ;;  %v1200_v12 = vperm.slane %v6121_v42, 7  ;;  %v4998_v15 = vld [vmem:[#allocation14 + $0x230] sm:$0xff] }
 0x5b9   : > { %3213 = vmatpush.bf16.msrb.mxu1 %v4981_v16  ;;  %3226 = vmatpush.bf16.msrb.mxu0 %v4989_v17  ;;  %v5006_v16 = vld [vmem:[#allocation14 + $0x270] sm:$0xff] }
 0x5ba   : > { %3187 = vmatpush.bf16.msra.mxu2 %v4965_v20  ;;  %3200 = vmatpush.bf16.msra.mxu3 %v4973_v21  ;;  %v5012_v21 = vld [vmem:[#allocation14 + $0x2a0] sm:$0xff] }
 0x5bd   : > { %3214 = vmatpush.bf16.msrb.mxu1 %v4980_v22  ;;  %3227 = vmatpush.bf16.msrb.mxu0 %v4988_v23  ;;  %v5020_v22 = vld [vmem:[#allocation14 + $0x2e0] sm:$0xff] }
 0x5be   : > { %3188 = vmatpush.bf16.msra.mxu2 %v4964_v24  ;;  %3201 = vmatpush.bf16.msra.mxu3 %v4972_v25  ;;  %v4997_v25 = vld [vmem:[#allocation14 + $0x228] sm:$0xff] }
 0x5c1   : > { %3215 = vmatpush.bf16.msrb.mxu1 %v4979_v26  ;;  %3228 = vmatpush.bf16.msrb.mxu0 %v4987_v27  ;;  %v5005_v26 = vld [vmem:[#allocation14 + $0x268] sm:$0xff]  ;;  %v1197_v27 = vperm.slane %v6121_v42, 4 }
 0x5c2   : > { %3189 = vmatpush.bf16.msra.mxu2 %v4963_v28  ;;  %3202 = vmatpush.bf16.msra.mxu3 %v4971_v29  ;;  %v1198_v28 = vperm.slane %v6121_v42, 5 }
 0x5c5   : > { %3216 = vmatpush.bf16.msrb.mxu1 %v4978_v30  ;;  %3229 = vmatpush.bf16.msrb.mxu0 %v4986_v32  ;;  %v5011_v32 = vld [vmem:[#allocation14 + $0x298] sm:$0xff] }
 0x5c6   : > { %3190 = vmatpush.bf16.msra.mxu2 %v4962_v33  ;;  %3203 = vmatpush.bf16.msra.mxu3 %v4970_v34  ;;  %v5019_v33 = vld [vmem:[#allocation14 + $0x2d8] sm:$0xff] }
 0x5c9   : > { %3217 = vmatpush.bf16.msrb.mxu1 %v4977_v35  ;;  %3230 = vmatpush.bf16.msrb.mxu0 %v4985_v36 }
 0x5ca   : > { %3191 = vmatpush.bf16.msra.mxu2 %v4961_v37  ;;  %3204 = vmatpush.bf16.msra.mxu3 %v4969_v38 }
 0x5cc   : > { %v1900_v19 = vpop.f32.mrf.mxu1  ;;  %v1913_v45 = vpop.f32.mrf.mxu0 }
 0x5cd   : > { %3218 = vmatpush.bf16.msrb.mxu1 %v4976_v13  ;;  %3231 = vmatpush.bf16.msrb.mxu0 %v4984_v39  ;;  %v1901_v46 = vadd.f32 %v1900_v19, %v1195_v43  ;;  %v1914_v47 = vadd.f32 %v1913_v45, %v1196_v44  ;;  %v4996_v39 = vld [vmem:[#allocation14 + $0x220] sm:$0xff]  ;;  %v5010_v19 = vld [vmem:[#allocation14 + $0x290] sm:$0xff] }
 0x5ce   : > { %3192 = vmatpush.bf16.msra.mxu2 %v4960_v40  ;;  %3205 = vmatpush.bf16.msra.mxu3 %v4968_v41  ;;  %v5004_v40 = vld [vmem:[#allocation14 + $0x260] sm:$0xff]  ;;  %v5018_v45 = vld [vmem:[#allocation14 + $0x2d0] sm:$0xff] }
 0x5cf   : > { %v2075_v50 = vmax.f32 %v1901_v46, 0.0  ;;  %v2076_v51 = vmax.f32 %v1914_v47, 0.0 }
 0x5d1   : > { %v2091_v53 = vpack.c.bf16 %v2075_v50, %v2075_v50  ;;  %v2092_v54 = vpack.c.bf16 %v2076_v51, %v2076_v51  ;;  %v1874_v55 = vpop.f32.mrf.mxu2  ;;  %v1887_v56 = vpop.f32.mrf.mxu3  ;;  %v5009_v50 = vld [vmem:[#allocation14 + $0x288] sm:$0xff] }
 0x5d2   : > { %v1875_v57 = vadd.f32 %v1874_v55, %v1193_v48  ;;  %v1888_v58 = vadd.f32 %v1887_v56, %v1194_v18  ;;  %v4995_v48 = vld [vmem:[#allocation14 + $0x218] sm:$0xff]  ;;  %v5017_v51 = vld [vmem:[#allocation14 + $0x2c8] sm:$0xff]  ;;  %v5002_v55 = vld [vmem:[#allocation14 + $0x250] sm:$0xff] }
 0x5d3   : > { %3167 = vmatmul.bf16.vlgmr.msra.gmra.mxu1 %v2091_v53  ;;  %3180 = vmatmul.bf16.vlgmr.msra.gmra.mxu0 %v2092_v54  ;;  %v5003_v18 = vld [vmem:[#allocation14 + $0x258] sm:$0xff]  ;;  %v4994_v54 = vld [vmem:[#allocation14 + $0x210] sm:$0xff] }
 0x5d4   : > { %v2073_v59 = vmax.f32 %v1875_v57, 0.0  ;;  %v2074_v60 = vmax.f32 %v1888_v58, 0.0  ;;  %3263 = vmatpush.bf16.msra.mxu1 %v5015_v31  ;;  %3276 = vmatpush.bf16.msra.mxu0 %v5023_v52  ;;  %v1902_v61 = vpop.f32.mrf.mxu1  ;;  %v1915_v62 = vpop.f32.mrf.mxu0  ;;  %v6131_v31 = vld [vmem:[#allocation13 + $0x8] sm:$0xff]  ;;  %v5008_v58 = vld [vmem:[#allocation14 + $0x280] sm:$0xff] }
 0x5d5   : > { %v1203_v56 = vperm.slane %v6131_v31, 2  ;;  %v1204_v57 = vperm.slane %v6131_v31, 3  ;;  %v5055_v61 = vld [vmem:[#allocation14 + $0x3f8] sm:$0xff] }
 0x5d6   : > { %v2089_v0 = vpack.c.bf16 %v2073_v59, %v2073_v59  ;;  %v2090_v2 = vpack.c.bf16 %v2074_v60, %v2074_v60  ;;  %v5016_v59 = vld [vmem:[#allocation14 + $0x2c0] sm:$0xff]  ;;  %v5047_v60 = vld [vmem:[#allocation14 + $0x3b8] sm:$0xff] }
 0x5d8   : > { %3264 = vmatpush.bf16.msra.mxu1 %v5014_v63  ;;  %3277 = vmatpush.bf16.msra.mxu0 %v5022_v1  ;;  %v4993_v1 = vld [vmem:[#allocation14 + $0x208] sm:$0xff] }
 0x5d9   : > { %3141 = vmatmul.bf16.vlgmr.msrb.gmra.mxu2 %v2089_v0  ;;  %3154 = vmatmul.bf16.vlgmr.msrb.gmra.mxu3 %v2090_v2  ;;  %v1876_v8 = vpop.f32.mrf.mxu2  ;;  %v1889_v9 = vpop.f32.mrf.mxu3  ;;  %v5001_v0 = vld [vmem:[#allocation14 + $0x248] sm:$0xff] }
 0x5da   : > { %3237 = vmatpush.bf16.msrb.mxu2 %v4999_v3  ;;  %3250 = vmatpush.bf16.msrb.mxu3 %v5007_v4  ;;  %v1201_v4 = vperm.slane %v6131_v31, 0  ;;  %v5046_v9 = vld [vmem:[#allocation14 + $0x3b0] sm:$0xff] }
 0x5dc   : > { %3265 = vmatpush.bf16.msra.mxu1 %v5013_v5  ;;  %3278 = vmatpush.bf16.msra.mxu0 %v5021_v6  ;;  %v1952_v17 = vpop.f32.mrf.mxu1  ;;  %v1965_v20 = vpop.f32.mrf.mxu0  ;;  %v1202_v5 = vperm.slane %v6131_v31, 1 }
 0x5dd   : > { %v1953_v23 = vadd.f32 %v1952_v17, %v1199_v11  ;;  %v1966_v24 = vadd.f32 %v1965_v20, %v1200_v12  ;;  %v5054_v11 = vld [vmem:[#allocation14 + $0x3f0] sm:$0xff]  ;;  %v4992_v20 = vld [vmem:[#allocation14 + $0x200] sm:$0xff] }
 0x5de   : > { %3238 = vmatpush.bf16.msrb.mxu2 %v4998_v15  ;;  %3251 = vmatpush.bf16.msrb.mxu3 %v5006_v16 }
 0x5df   : > { %v2079_v29 = vmax.f32 %v1953_v23, 0.0  ;;  %v2080_v30 = vmax.f32 %v1966_v24, 0.0  ;;  %v5031_v24 = vld [vmem:[#allocation14 + $0x338] sm:$0xff] }
 0x5e0   : > { %3266 = vmatpush.bf16.msra.mxu1 %v5012_v21  ;;  %3279 = vmatpush.bf16.msra.mxu0 %v5020_v22  ;;  %v5000_v21 = vld [vmem:[#allocation14 + $0x240] sm:$0xff] }
 0x5e1   : > { %v2095_v34 = vpack.c.bf16 %v2079_v29, %v2079_v29  ;;  %v2096_v35 = vpack.c.bf16 %v2080_v30, %v2080_v30  ;;  %v1926_v36 = vpop.f32.mrf.mxu2  ;;  %v1939_v37 = vpop.f32.mrf.mxu3  ;;  %v5045_v30 = vld [vmem:[#allocation14 + $0x3a8] sm:$0xff] }
 0x5e2   : > { %3239 = vmatpush.bf16.msrb.mxu2 %v4997_v25  ;;  %3252 = vmatpush.bf16.msrb.mxu3 %v5005_v26  ;;  %v1927_v38 = vadd.f32 %v1926_v36, %v1197_v27  ;;  %v1940_v13 = vadd.f32 %v1939_v37, %v1198_v28  ;;  %v5039_v25 = vld [vmem:[#allocation14 + $0x378] sm:$0xff]  ;;  %v5038_v36 = vld [vmem:[#allocation14 + $0x370] sm:$0xff]  ;;  %v5044_v37 = vld [vmem:[#allocation14 + $0x3a0] sm:$0xff] }
 0x5e3   : > { %3219 = vmatmul.bf16.vlgmr.msrb.gmra.mxu1 %v2095_v34  ;;  %3232 = vmatmul.bf16.vlgmr.msrb.gmra.mxu0 %v2096_v35  ;;  %v5030_v35 = vld [vmem:[#allocation14 + $0x330] sm:$0xff] }
 0x5e4   : > { %v2077_v41 = vmax.f32 %v1927_v38, 0.0  ;;  %v2078_v42 = vmax.f32 %v1940_v13, 0.0  ;;  %3267 = vmatpush.bf16.msra.mxu1 %v5011_v32  ;;  %3280 = vmatpush.bf16.msra.mxu0 %v5019_v33  ;;  %v1954_v43 = vpop.f32.mrf.mxu1  ;;  %v1967_v44 = vpop.f32.mrf.mxu0  ;;  %v5053_v32 = vld [vmem:[#allocation14 + $0x3e8] sm:$0xff]  ;;  %v5052_v38 = vld [vmem:[#allocation14 + $0x3e0] sm:$0xff] }
 0x5e5   : > { %v5051_v43 = vld [vmem:[#allocation14 + $0x3d8] sm:$0xff]  ;;  %v5028_v44 = vld [vmem:[#allocation14 + $0x320] sm:$0xff] }
 0x5e6   : > { %v2093_v46 = vpack.c.bf16 %v2077_v41, %v2077_v41  ;;  %v2094_v47 = vpack.c.bf16 %v2078_v42, %v2078_v42  ;;  %3240 = vmatpush.bf16.msrb.mxu2 %v4996_v39  ;;  %3253 = vmatpush.bf16.msrb.mxu3 %v5004_v40  ;;  %v5029_v40 = vld [vmem:[#allocation14 + $0x328] sm:$0xff]  ;;  %v5043_v42 = vld [vmem:[#allocation14 + $0x398] sm:$0xff] }
 0x5e7   : > { %v5037_v41 = vld [vmem:[#allocation14 + $0x368] sm:$0xff] }
 0x5e8   : > { %3268 = vmatpush.bf16.msra.mxu1 %v5010_v19  ;;  %3281 = vmatpush.bf16.msra.mxu0 %v5018_v45  ;;  %v5036_v19 = vld [vmem:[#allocation14 + $0x360] sm:$0xff]  ;;  %v5042_v45 = vld [vmem:[#allocation14 + $0x390] sm:$0xff] }
 0x5e9   : > { %3193 = vmatmul.bf16.vlgmr.msra.gmra.mxu2 %v2093_v46  ;;  %3206 = vmatmul.bf16.vlgmr.msra.gmra.mxu3 %v2094_v47  ;;  %v1928_v52 = vpop.f32.mrf.mxu2  ;;  %v1941_v53 = vpop.f32.mrf.mxu3  ;;  %v5050_v46 = vld [vmem:[#allocation14 + $0x3d0] sm:$0xff]  ;;  %v5027_v47 = vld [vmem:[#allocation14 + $0x318] sm:$0xff] }
 0x5ea   : > { %3241 = vmatpush.bf16.msrb.mxu2 %v4995_v48  ;;  %3254 = vmatpush.bf16.msrb.mxu3 %v5003_v18  ;;  %v5035_v48 = vld [vmem:[#allocation14 + $0x358] sm:$0xff]  ;;  %v5041_v18 = vld [vmem:[#allocation14 + $0x388] sm:$0xff]  ;;  %v1208_v52 = vperm.slane %v6131_v31, 7  ;;  %v5026_v53 = vld [vmem:[#allocation14 + $0x310] sm:$0xff] }
 0x5ec   : > { %3269 = vmatpush.bf16.msra.mxu1 %v5009_v50  ;;  %3282 = vmatpush.bf16.msra.mxu0 %v5017_v51  ;;  %v5049_v50 = vld [vmem:[#allocation14 + $0x3c8] sm:$0xff]  ;;  %v1207_v51 = vperm.slane %v6131_v31, 6 }
 0x5ee   : > { %3242 = vmatpush.bf16.msrb.mxu2 %v4994_v54  ;;  %3255 = vmatpush.bf16.msrb.mxu3 %v5002_v55  ;;  %v5034_v54 = vld [vmem:[#allocation14 + $0x350] sm:$0xff]  ;;  %v5040_v55 = vld [vmem:[#allocation14 + $0x380] sm:$0xff] }
 0x5ef   : > { %v2004_v62 = vpop.f32.mrf.mxu1  ;;  %v2017_v63 = vpop.f32.mrf.mxu0 }
 0x5f0   : > { %v2005_v2 = vadd.f32 %v2004_v62, %v1203_v56  ;;  %v2018_v3 = vadd.f32 %v2017_v63, %v1204_v57  ;;  %3270 = vmatpush.bf16.msra.mxu1 %v5008_v58  ;;  %3283 = vmatpush.bf16.msra.mxu0 %v5016_v59  ;;  %v5048_v56 = vld [vmem:[#allocation14 + $0x3c0] sm:$0xff]  ;;  %v5033_v62 = vld [vmem:[#allocation14 + $0x348] sm:$0xff]  ;;  %v1205_v63 = vperm.slane %v6131_v31, 4 }
 0x5f2   : > { %v2083_v6 = vmax.f32 %v2005_v2, 0.0  ;;  %v2084_v8 = vmax.f32 %v2018_v3, 0.0  ;;  %3243 = vmatpush.bf16.msrb.mxu2 %v4993_v1  ;;  %3256 = vmatpush.bf16.msrb.mxu3 %v5001_v0  ;;  %v1978_v16 = vpop.f32.mrf.mxu2  ;;  %v1991_v17 = vpop.f32.mrf.mxu3  ;;  %v1206_v1 = vperm.slane %v6131_v31, 5 }
 0x5f3   : > { %v1979_v22 = vadd.f32 %v1978_v16, %v1201_v4  ;;  %v1992_v23 = vadd.f32 %v1991_v17, %v1202_v5 }
 0x5f4   : > { %3315 = vmatpush.bf16.msrb.mxu1 %v5047_v60  ;;  %3328 = vmatpush.bf16.msrb.mxu0 %v5055_v61  ;;  %v2099_v12 = vpack.c.bf16 %v2083_v6, %v2083_v6  ;;  %v2100_v15 = vpack.c.bf16 %v2084_v8, %v2084_v8  ;;  %v5025_v61 = vld [vmem:[#allocation14 + $0x308] sm:$0xff]  ;;  %v5024_v8 = vld [vmem:[#allocation14 + $0x300] sm:$0xff] }
 0x5f5   : > { %v2081_v26 = vmax.f32 %v1979_v22, 0.0  ;;  %v2082_v27 = vmax.f32 %v1992_v23, 0.0 }
 0x5f6   : > { %3271 = vmatmul.bf16.vlgmr.msra.gmra.mxu1 %v2099_v12  ;;  %3284 = vmatmul.bf16.vlgmr.msra.gmra.mxu0 %v2100_v15 }
 0x5f7   : > { %v2006_v28 = vpop.f32.mrf.mxu1  ;;  %v2019_v29 = vpop.f32.mrf.mxu0  ;;  %3244 = vmatpush.bf16.msrb.mxu2 %v4992_v20  ;;  %3257 = vmatpush.bf16.msrb.mxu3 %v5000_v21  ;;  %v2097_v33 = vpack.c.bf16 %v2081_v26, %v2081_v26  ;;  %v2098_v34 = vpack.c.bf16 %v2082_v27, %v2082_v27 }
 0x5f8   : > { %3316 = vmatpush.bf16.msrb.mxu1 %v5046_v9  ;;  %3329 = vmatpush.bf16.msrb.mxu0 %v5054_v11  ;;  %v5032_v9 = vld [vmem:[#allocation14 + $0x340] sm:$0xff] }
 0x5fa   : > { %3245 = vmatmul.bf16.vlgmr.msrb.gmra.mxu2 %v2097_v33  ;;  %3258 = vmatmul.bf16.vlgmr.msrb.gmra.mxu3 %v2098_v34  ;;  %v1980_v13 = vpop.f32.mrf.mxu2  ;;  %v1993_v39 = vpop.f32.mrf.mxu3 }
 0x5fb   : > { %3289 = vmatpush.bf16.msra.mxu2 %v5031_v24  ;;  %3302 = vmatpush.bf16.msra.mxu3 %v5039_v25  ;;  %v5226_v13 = vld [vmem:[%s6292_s1] ss:$0 sm:$0xff] }
 0x5fc   : > { %3317 = vmatpush.bf16.msrb.mxu1 %v5045_v30  ;;  %3330 = vmatpush.bf16.msrb.mxu0 %v5053_v32 }
 0x5ff   : > { %3290 = vmatpush.bf16.msra.mxu2 %v5030_v35  ;;  %3303 = vmatpush.bf16.msra.mxu3 %v5038_v36 }
 0x600   : > { %3318 = vmatpush.bf16.msrb.mxu1 %v5044_v37  ;;  %3331 = vmatpush.bf16.msrb.mxu0 %v5052_v38 }
 0x603   : > { %3291 = vmatpush.bf16.msra.mxu2 %v5029_v40  ;;  %3304 = vmatpush.bf16.msra.mxu3 %v5037_v41 }
 0x604   : > { %3319 = vmatpush.bf16.msrb.mxu1 %v5043_v42  ;;  %3332 = vmatpush.bf16.msrb.mxu0 %v5051_v43 }
 0x607   : > { %3292 = vmatpush.bf16.msra.mxu2 %v5028_v44  ;;  %3305 = vmatpush.bf16.msra.mxu3 %v5036_v19 }
 0x608   : > { %3320 = vmatpush.bf16.msrb.mxu1 %v5042_v45  ;;  %3333 = vmatpush.bf16.msrb.mxu0 %v5050_v46 }
 0x60b   : > { %3293 = vmatpush.bf16.msra.mxu2 %v5027_v47  ;;  %3306 = vmatpush.bf16.msra.mxu3 %v5035_v48 }
 0x60c   : > { %3321 = vmatpush.bf16.msrb.mxu1 %v5041_v18  ;;  %3334 = vmatpush.bf16.msrb.mxu0 %v5049_v50 }
 0x60d   : > { %v2056_v57 = vpop.f32.mrf.mxu1  ;;  %v2069_v58 = vpop.f32.mrf.mxu0 }
 0x60e   : > { %v2057_v59 = vadd.f32 %v2056_v57, %v1207_v51  ;;  %v2070_v60 = vadd.f32 %v2069_v58, %v1208_v52 }
 0x60f   : > { %3294 = vmatpush.bf16.msra.mxu2 %v5026_v53  ;;  %3307 = vmatpush.bf16.msra.mxu3 %v5034_v54 }
 0x610   : > { %v2087_v0 = vmax.f32 %v2057_v59, 0.0  ;;  %v2088_v2 = vmax.f32 %v2070_v60, 0.0  ;;  %3322 = vmatpush.bf16.msrb.mxu1 %v5040_v55  ;;  %3335 = vmatpush.bf16.msrb.mxu0 %v5048_v56 }
 0x612   : > { %v2103_v3 = vpack.c.bf16 %v2087_v0, %v2087_v0  ;;  %v2104_v4 = vpack.c.bf16 %v2088_v2, %v2088_v2  ;;  %v2030_v5 = vpop.f32.mrf.mxu2  ;;  %v2043_v6 = vpop.f32.mrf.mxu3 }
 0x613   : > { %3295 = vmatpush.bf16.msra.mxu2 %v5025_v61  ;;  %3308 = vmatpush.bf16.msra.mxu3 %v5033_v62  ;;  %v2031_v11 = vadd.f32 %v2030_v5, %v1205_v63  ;;  %v2044_v12 = vadd.f32 %v2043_v6, %v1206_v1 }
 0x614   : > { %3323 = vmatmul.bf16.vlgmr.msrb.gmra.mxu1 %v2103_v3  ;;  %3336 = vmatmul.bf16.vlgmr.msrb.gmra.mxu0 %v2104_v4 }
 0x615   : > { %v2085_v15 = vmax.f32 %v2031_v11, 0.0  ;;  %v2086_v16 = vmax.f32 %v2044_v12, 0.0  ;;  %v2058_v17 = vpop.f32.mrf.mxu1  ;;  %v2071_v31 = vpop.f32.mrf.mxu0 }
 0x617   : > { %3296 = vmatpush.bf16.msra.mxu2 %v5024_v8  ;;  %3309 = vmatpush.bf16.msra.mxu3 %v5032_v9  ;;  %v2101_v20 = vpack.c.bf16 %v2085_v15, %v2085_v15  ;;  %v2102_v21 = vpack.c.bf16 %v2086_v16, %v2086_v16 }
 0x61a   : > { %3297 = vmatmul.bf16.vlgmr.msra.gmra.mxu2 %v2101_v20  ;;  %3310 = vmatmul.bf16.vlgmr.msra.gmra.mxu3 %v2102_v21  ;;  %v2032_v22 = vpop.f32.mrf.mxu2  ;;  %v2045_v23 = vpop.f32.mrf.mxu3 }
 0x650   : > { %v3168_v24 = vpop.f32.mrf.mxu1  ;;  %v3181_v25 = vpop.f32.mrf.mxu0 }
 0x658   : > { %v3170_v26 = vpop.f32.mrf.mxu1  ;;  %v3183_v27 = vpop.f32.mrf.mxu0 }
 0x65c   : > { %v3142_v28 = vpop.f32.mrf.mxu2  ;;  %v3155_v29 = vpop.f32.mrf.mxu3 }
 0x65d   : > { %v3143_v39 = vadd.f32 %v5226_v13, %v3142_v28 }
 0x65f   : > { %v3156_v44 = vadd.f32 %v3155_v29, %v3143_v39 }
 0x660   : > { %v3220_v30 = vpop.f32.mrf.mxu1  ;;  %v3233_v32 = vpop.f32.mrf.mxu0 }
 0x661   : > { %v3169_v19 = vadd.f32 %v3168_v24, %v3156_v44 }
 0x663   : > { %v3182_v47 = vadd.f32 %v3181_v25, %v3169_v19 }
 0x664   : > { %v3144_v33 = vpop.f32.mrf.mxu2  ;;  %v3157_v34 = vpop.f32.mrf.mxu3 }
 0x668   : > { %v3222_v35 = vpop.f32.mrf.mxu1  ;;  %v3235_v36 = vpop.f32.mrf.mxu0 }
 0x66c   : > { %v3194_v37 = vpop.f32.mrf.mxu2  ;;  %v3207_v38 = vpop.f32.mrf.mxu3 }
 0x66d   : > { %v3195_v50 = vadd.f32 %v3194_v37, %v3182_v47 }
 0x66f   : > { %v3208_v51 = vadd.f32 %v3207_v38, %v3195_v50 }
 0x671   : > { %v3221_v54 = vadd.f32 %v3220_v30, %v3208_v51 }
 0x673   : > { %v3272_v40 = vpop.f32.mrf.mxu1  ;;  %v3285_v41 = vpop.f32.mrf.mxu0  ;;  %v3234_v55 = vadd.f32 %v3233_v32, %v3221_v54 }
 0x674   : > { %v3196_v42 = vpop.f32.mrf.mxu2  ;;  %v3209_v43 = vpop.f32.mrf.mxu3 }
 0x67b   : > { %v3274_v45 = vpop.f32.mrf.mxu1  ;;  %v3287_v46 = vpop.f32.mrf.mxu0 }
 0x67d   : > { %v3246_v48 = vpop.f32.mrf.mxu2  ;;  %v3259_v18 = vpop.f32.mrf.mxu3 }
 0x67e   : > { %v3247_v56 = vadd.f32 %v3246_v48, %v3234_v55 }
 0x680   : > { %v3260_v59 = vadd.f32 %v3259_v18, %v3247_v56 }
 0x682   : > { %v3273_v60 = vadd.f32 %v3272_v40, %v3260_v59 }
 0x684   : > { %v3286_v63 = vadd.f32 %v3285_v41, %v3273_v60 }
 0x685   : > { %v3248_v52 = vpop.f32.mrf.mxu2  ;;  %v3261_v53 = vpop.f32.mrf.mxu3 }
 0x691   : > { %v3324_v57 = vpop.f32.mrf.mxu1  ;;  %v3337_v58 = vpop.f32.mrf.mxu0 }
 0x699   : > { %v3326_v61 = vpop.f32.mrf.mxu1  ;;  %v3339_v62 = vpop.f32.mrf.mxu0 }
 0x69d   : > { %v3298_v1 = vpop.f32.mrf.mxu2  ;;  %v3311_v0 = vpop.f32.mrf.mxu3 }
 0x69e   : > { %v3299_v2 = vadd.f32 %v3298_v1, %v3286_v63 }
 0x6a0   : > { %v3312_v3 = vadd.f32 %v3311_v0, %v3299_v2 }
 0x6a2   : > { %v3325_v4 = vadd.f32 %v3324_v57, %v3312_v3  ;;  %3345 = sbr.rel (%p4760_p1) target bundleno = 1705 (0x6a9), region = 112 }
 0x6a4   : > { %v3338_v5 = vadd.f32 %v3337_v58, %v3325_v4 }
 0x6a5   : > { %v3300_v6 = vpop.f32.mrf.mxu2  ;;  %v3313_v8 = vpop.f32.mrf.mxu3 }
 0x6a6   : > { %v3341_v9 = vadd.f32 %v3338_v5, %v6086_v49 }
 0x6a8   : > { %3346 = vst [vmem:[%s5978_s22] sm:$0xff] %v3341_v9 }
 0x6a9 PF: > { %s6294_s6 = sld [smem:[#allocation26_spill]] }
 0x6af   : > { %p4761_p0 = scmp.ne.s32.totalorder %s6294_s6, 1 }
 0x6b1   : > { %3350 = sbr.rel (%p4761_p0) target bundleno = 1985 (0x7c1), region = 116 }
 0x6b6   : > { %3351 = vadd.xlane.f32.xlu0 %v3341_v9 }
 0x729   : > { %v3352_v11 = vpop.xlane.xlu0 %3351 }
 0x72a   : > { %v3353_v12 = vmul.f32 %v3352_v11, %v5990_v14 }
 0x72c   : > { %v3354_v15 = vsub.f32 %v3341_v9, %v3353_v12 }
 0x72e   : > { %v3355_v16 = vmul.f32 %v3354_v15, %v3354_v15 }
 0x730   : > { %3356 = vadd.xlane.f32.xlu0 %v3355_v16 }
 0x7a3   : > { %v3357_v17 = vpop.xlane.xlu0 %3356 }
 0x7a4   : > { %v3358_v31 = vmul.f32 %v3357_v17, %v5990_v14 }
 0x7a6   : > { %v3359_v49 = vadd.f32 1e-06, %v3358_v31 }
 0x7a8   : > { %5243 = vrsqrt.f32 %v3359_v49  ;;  %vm3366_vm14 = vweird.f32 %v3359_v49 }
 0x7ae   : > { %v5244_v20 = vpop.eup %5243 }
 0x7af   : > { %v3361_v21 = vmul.f32 %v5244_v20, %v3359_v49  ;;  %vm3367_vm13 = vweird.f32 %v5244_v20 }
 0x7b0   : > { %vm3368_vm15 = vmor %vm3366_vm14, %vm3367_vm13 }
 0x7b1   : > { %v3362_v22 = vmul.f32 %v5244_v20, %v3361_v21 }
 0x7b3   : > { %v3363_v23 = vmul.f32 0.5, %v3362_v22 }
 0x7b5   : > { %v3364_v24 = vsub.f32 1.5, %v3363_v23 }
 0x7b7   : > { %v3365_v25 = vmul.f32 %v5244_v20, %v3364_v24 }
 0x7b9   : > { %v3369_v26 = vsel %vm3368_vm15, %v5244_v20, %v3365_v25 }
 0x7ba   : > { %v3370_v27 = vmul.f32 %v3369_v26, %v3354_v15 }
 0x7bc   : > { %v3371_v28 = vmul.f32 %v6030_v7, %v3370_v27 }
 0x7be   : > { %v3372_v29 = vadd.f32 %v6033_v10, %v3371_v28 }
 0x7c0   : > { %3373 = vst [vmem:[%s5978_s22] sm:$0xff] %v3372_v29 }
 0x7c1 PF: > { %s6295_s15 = sld [smem:[#allocation27_spill]]  ;;  %s3387_s5 = sshll.u32 %s5978_s22, 4  ;;  %s3388_s5 = int_to_ptr.vmem [resolvable:$true] %s3387_s5 }
 0x7c2   : > { %s6296_s20 = sld [smem:[#allocation48_spill]]  ;;  %s3375_s24 = scalar_lea.sflag [#allocation4], %s5935_s11 }
 0x7c7   : > { %s4763_s3 = sshll.u32 %s6295_s15, 3 }
 0x7c8   : > { %s3385_s19 = scalar_lea.hbm %s6296_s20, %s4763_s3  ;;  %s5505_s9 = scalar_lea.hbm %s6296_s20, 16 }
 0x7c9   : > { %s3389_s10 = sshll.u32 %s3385_s19, 4  ;;  %s3390_s10 = int_to_ptr.hbm [resolvable:$true] %s3389_s10 }
 0x7ca   : > { %s5499_s30 = sshra.s32 %s3390_s10, 4  ;;  %s5500_s30 = int_to_ptr.hbm [resolvable:$true] %s5499_s30 }
 0x7cb   : > { %s5501_s16 = scalar_lea.hbm %s5500_s30, 8  ;;  %p5506_p13 = scmp.lt.s32.totalorder %s5500_s30, %s6296_s20 }
 0x7cc   : > { %p5502_p8 = scmp.ne.s32.totalorder %s5500_s30, %s5501_s16  ;;  %p5507_p7 = scmp.lt.s32.totalorder %s5505_s9, %s5501_s16 }
 0x7ce   : > { %p5503_p9 = pnand %p5502_p8, %p5895_p5  ;;  %p5508_p6 = por %p5507_p7, %p5506_p13 }
 0x7d0   : > { %p5504_p10 = pneg %p5503_p9 }
 0x7d2   : > { %p5509_p2 = pnand %p5508_p6, %p5504_p10 }
 0x7d4   : > { %5512 = shalt.err (!%p5509_p2)
}
 0x7d5   : > { %5080 = dma.vmem_to_hbm [thread:$0]  (%p5895_p5), %s3388_s5, 128, %s3390_s10, %s3375_s24  }
 0x7d6 PF: > { %p5121_p4 = scmp.ge.s32.totalorder %s5627_s18, 2  ;;  %s3401_s11 = sand.u32 1, %s5599_s28  }
 0x7d7   : > { %s3402_s22 = scalar_lea.sflag [#allocation4], %s3401_s11 }
 0x7d8   : > { %p5109_p3 = pnand %p5121_p4, %p5902_p12 }
 0x7da   : > { %p5110_p11 = pneg %p5109_p3 }
 0x7dc   : > { %5582 = dma.done.wait (%p5110_p11), %s3402_s22, 128  }
 0x7dd   : > { %5584 = vsyncadd (%p5110_p11), %s3402_s22, 4294967168  ;;  %s37_s18 = sadd.s32 1, %s5627_s18   ;;  %s6297_s25 = sld [smem:[#allocation24_spill]] }
 0x7de   : > { %p34_p1 = scmp.ge.s32.totalorder %s37_s18, 6   ;;  %s6298_s23 = sld [smem:[#allocation31_spill]] }
 0x7df   : > { %s6299_s8 = sld [smem:[#allocation25_spill]]  ;;  %s6304_s26 = smov %s5595_s27 }
 0x7e0   : > { %s6300_s30 = sld [smem:[#allocation34_spill]]  ;;  %s6306_s28 = smov %s5603_s29 }
 0x7e1   : > { %s6301_s14 = sld [smem:[#allocation28_spill]]  ;;  %s6308_s15 = smov %s5623_s17 }
 0x7e2   : > { %s6302_s16 = sld [smem:[#allocation30_spill]] }
 0x7e3   : > { %s6303_s13 = sld [smem:[#allocation33_spill]] }
 0x7e4   : > { %s6305_s27 = smov %s6298_s23 }
 0x7e5   : > { %s6307_s29 = smov %s6299_s8  ;;  %36 = sbr.rel (!%p34_p1) target bundleno = 30 (0x1e), region = 185 }
 0x7e9   : > { %s6309_s17 = smov %s6303_s13 }
 0x7ea   :  { %3408 = vsyncpa [#allocation3], 1 }
 0x7eb   :  { %3410 = vsyncpa [#allocation3 + $0x1], 1 }
 0x7ec   :  { %3411 = vsyncpa [#allocation6], 1 }
 0x7ed   :  { %3413 = vsyncpa [#allocation6 + $0x1], 1 }
 0x7ee   :  { %3414 = vsyncpa [#allocation9], 1 }
 0x7ef   :  { %3416 = vsyncpa [#allocation9 + $0x1], 1 }
 0x7f0   :  { %3417 = vsyncpa [#allocation12], 1 }
 0x7f1   :  { %3418 = vsyncpa [#allocation15], 1 }
 0x7f2   :  { %3419 = vsyncpa [#allocation4], 1 }
 0x7f3   :  { %3421 = vsyncpa [#allocation4 + $0x1], 1 }

</bundles_post_ra>
